<compile_context>
chip_gen: v6e
topology: v6e:2x2x1
jax: 0.10.0
libtpu: 0.0.40
codegen_flags: <defaults>
</compile_context>

<pallas_src>
import functools

import jax
import jax.numpy as jnp
from jax.experimental import pallas as pl
from jax.experimental.pallas import tpu as pltpu


def gru_kernel(len_smem_ref,      # (B_pad,) int32, SMEM (scalar prefetch)
               x_ref,             # (TT, TB, E) bf16     (time block of embeddings)
               len_ref,           # (TB, 1) int32        (per-row lengths, VMEM)
               w_ih_ref,          # (E, 3H) bf16, whole-array VMEM
               w_hh_ref,          # (H, 3H) bf16, whole-array VMEM
               b_i_ref,           # (1, 3H) f32   (b_ih[r,z,n] + b_hh[r,z] folded in)
               b_hn_ref,          # (1, H)  f32   (b_hh[n], stays inside r*(...))
               w_lin_ref,         # (1, H)  f32
               b_lin_ref,         # (1, 1)  f32
               out_ref,           # (TB, 1) f32
               h_ref):            # (TB, H) f32 scratch, carried across time blocks
    b_blk = pl.program_id(0)
    t_blk = pl.program_id(1)
    n_t = pl.num_programs(1)
    TT, TB, _ = x_ref.shape
    H = h_ref.shape[-1]

    @pl.when(t_blk == 0)
    def _init():
        h_ref[...] = jnp.zeros_like(h_ref)

    # Longest sequence in this batch block (pack_padded_sequence requires lengths
    # sorted in decreasing order) -> skip time blocks that are pure padding.
    blk_max_len = len_smem_ref[b_blk * TB]

    @pl.when(t_blk * TT < blk_max_len)
    def _compute():
        lens = len_ref[...]                                      # (TB, 1) int32
        # hoist bias broadcasts out of the unrolled loop (JAX does not CSE them)
        b_i = jnp.broadcast_to(b_i_ref[...], (TB, 3 * H))
        b_hn = jnp.broadcast_to(b_hn_ref[...], (TB, H))
        t0 = t_blk * TT

        def step(i, h):
            x_t = x_ref[i]                                       # (TB, E) bf16
            # two fused MXU matmuls per timestep, f32 accumulation
            gi = jnp.dot(x_t, w_ih_ref[...],
                         preferred_element_type=jnp.float32) + b_i
            gh = jnp.dot(h.astype(w_hh_ref.dtype), w_hh_ref[...],
                         preferred_element_type=jnp.float32)
            r = jax.nn.sigmoid(gi[:, :H] + gh[:, :H])
            z = jax.nn.sigmoid(gi[:, H:2 * H] + gh[:, H:2 * H])
            n = jnp.tanh(gi[:, 2 * H:] + r * (gh[:, 2 * H:] + b_hn))
            h_new = (1.0 - z) * n + z * h
            # pack_padded_sequence: only update rows with t < length
            valid = (t0 + i) < lens                              # (TB, 1) bool
            return jnp.where(valid, h_new, h)

        h_ref[...] = jax.lax.fori_loop(0, TT, step, h_ref[...], unroll=True)

    @pl.when(t_blk == n_t - 1)
    def _finalize():
        # Linear(H, 1) as a VPU multiply + lane reduction (avoids an (H,1) matmul)
        h = h_ref[...]
        w = jnp.broadcast_to(w_lin_ref[...], h.shape)
        out_ref[...] = jnp.sum(h * w, axis=-1, keepdims=True) + b_lin_ref[...]


def _ceil_to(x, m):
    return (x + m - 1) // m * m


@functools.partial(jax.jit, static_argnames=("time_block", "batch_block"))
def rnn_forward(tokens, lengths, params, *, time_block=8, batch_block=8):
    """tokens: (T, B) int32 time-major, lengths: (B,) int (sorted descending, as
    pack_padded_sequence requires).  Returns (B,) float32 logits."""
    # TODO(synk): embedding gather stays in XLA (table may not fit VMEM); fusing it
    # would require an in-kernel row-gather DMA.
    emb = params["embedding"][tokens].astype(jnp.bfloat16)       # (T, B, E)
    T, B, E = emb.shape
    H = params["w_hh"].shape[-1]
    TT, TB = time_block, batch_block

    # Fused, MXU-friendly weight layout: gates stacked along the lane axis [r|z|n].
    w_ih, w_hh = params["w_ih"], params["w_hh"]
    b_ih, b_hh = params["b_ih"], params["b_hh"]
    w_ih_f = jnp.concatenate([w_ih[0], w_ih[1], w_ih[2]], axis=1).astype(jnp.bfloat16)
    w_hh_f = jnp.concatenate([w_hh[0], w_hh[1], w_hh[2]], axis=1).astype(jnp.bfloat16)
    # r/z hidden biases can be pre-added to the input bias; b_hh[n] must stay
    # separate because it sits inside r * (h @ W_hn + b_hn).
    b_i_f = jnp.concatenate([b_ih[0] + b_hh[0], b_ih[1] + b_hh[1], b_ih[2]], axis=1)
    b_hn = b_hh[2]
    w_lin = params["w_lin"].reshape(1, H).astype(jnp.float32)
    b_lin = params["b_lin"].reshape(1, 1).astype(jnp.float32)

    # Pad time to a multiple of TT and batch to a multiple of TB (padded rows get
    # length 0, so they never update the hidden state and are sliced off at the end).
    T_pad, B_pad = _ceil_to(T, TT), _ceil_to(B, TB)
    emb = jnp.pad(emb, ((0, T_pad - T), (0, B_pad - B), (0, 0)))
    lengths = jnp.pad(lengths.astype(jnp.int32), (0, B_pad - B))
    lengths2d = lengths.reshape(B_pad, 1)

    grid = (B_pad // TB, T_pad // TT)

    out = pl.pallas_call(
        gru_kernel,
        out_shape=jax.ShapeDtypeStruct((B_pad, 1), jnp.float32),
        grid_spec=pltpu.PrefetchScalarGridSpec(
            num_scalar_prefetch=1,                               # lengths -> SMEM
            grid=grid,
            in_specs=[
                pl.BlockSpec((TT, TB, E), lambda b, t, lens: (t, b, 0)),  # x block
                pl.BlockSpec((TB, 1), lambda b, t, lens: (b, 0)),         # lengths
                pl.BlockSpec(memory_space=pltpu.MemorySpace.VMEM),        # W_ih fused
                pl.BlockSpec(memory_space=pltpu.MemorySpace.VMEM),        # W_hh fused
                pl.BlockSpec(memory_space=pltpu.MemorySpace.VMEM),        # b_i fused
                pl.BlockSpec(memory_space=pltpu.MemorySpace.VMEM),        # b_hn
                pl.BlockSpec(memory_space=pltpu.MemorySpace.VMEM),        # w_lin row
                pl.BlockSpec(memory_space=pltpu.MemorySpace.VMEM),        # b_lin
            ],
            out_specs=pl.BlockSpec((TB, 1), lambda b, t, lens: (b, 0)),
            scratch_shapes=[pltpu.VMEM((TB, H), jnp.float32)],
        ),
        compiler_params=pltpu.CompilerParams(
            dimension_semantics=("parallel", "arbitrary"),
            vmem_limit_bytes=48 * 1024 * 1024,
        ),
    )(lengths, emb, lengths2d, w_ih_f, w_hh_f, b_i_f, b_hn, w_lin, b_lin)

    return out[:B, 0]                                            # == x.squeeze()


def rnn_reference(tokens, lengths, params):
    """Pure-JAX reference mirroring the kernel's bf16-weight / f32-state math."""
    emb = params["embedding"][tokens].astype(jnp.bfloat16)
    T, B, _ = emb.shape
    H = params["w_hh"].shape[-1]
    w_ih = params["w_ih"].astype(jnp.bfloat16)
    w_hh = params["w_hh"].astype(jnp.bfloat16)
    b_ih, b_hh = params["b_ih"], params["b_hh"]

    def step(h, inp):
        x_t, t = inp
        hb = h.astype(jnp.bfloat16)
        gi = lambda g: jnp.dot(x_t, w_ih[g], preferred_element_type=jnp.float32) + b_ih[g]
        gh = lambda g: jnp.dot(hb, w_hh[g], preferred_element_type=jnp.float32) + b_hh[g]
        r = jax.nn.sigmoid(gi(0) + gh(0))
        z = jax.nn.sigmoid(gi(1) + gh(1))
        n = jnp.tanh(gi(2) + r * gh(2))
        h_new = (1.0 - z) * n + z * h
        mask = (t < lengths)[:, None]
        return jnp.where(mask, h_new, h), None

    h0 = jnp.zeros((B, H), jnp.float32)
    hT, _ = jax.lax.scan(step, h0, (emb, jnp.arange(T)))
    return (hT @ params["w_lin"] + params["b_lin"].reshape(1, 1)).reshape(B)


def make_params(key, vocab_size, embed_dim, hidden_dim):
    ks = jax.random.split(key, 7)
    s = 1.0 / jnp.sqrt(hidden_dim)
    return {
        "embedding": jax.random.normal(ks[0], (vocab_size, embed_dim), jnp.float32) * 0.1,
        "w_ih": jax.random.uniform(ks[1], (3, embed_dim, hidden_dim), jnp.float32, -s, s),
        "w_hh": jax.random.uniform(ks[2], (3, hidden_dim, hidden_dim), jnp.float32, -s, s),
        "b_ih": jax.random.uniform(ks[3], (3, 1, hidden_dim), jnp.float32, -s, s),
        "b_hh": jax.random.uniform(ks[4], (3, 1, hidden_dim), jnp.float32, -s, s),
        "w_lin": jax.random.uniform(ks[5], (hidden_dim, 1), jnp.float32, -s, s),
        "b_lin": jax.random.uniform(ks[6], (1, 1), jnp.float32, -s, s),
    }


if __name__ == "__main__":
    # small, lane-aligned shapes: E = H = 128, B padded to 16, T padded to 16
    T, B, E, H, VOCAB = 12, 12, 128, 128, 64

    key = jax.random.PRNGKey(0)
    k_tok, k_par = jax.random.split(key)

    tokens = jax.random.randint(k_tok, (T, B), 0, VOCAB, dtype=jnp.int32)
    # pack_padded_sequence expects lengths sorted in decreasing order
    lengths = jnp.array([12, 11, 10, 9, 8, 7, 6, 5, 4, 3, 2, 1], dtype=jnp.int32)
    params = make_params(k_par, VOCAB, E, H)

    out = jax.block_until_ready(rnn_forward(tokens, lengths, params))
    ref = jax.block_until_ready(rnn_reference(tokens, lengths, params))

    assert out.shape == (B,)
    assert jnp.allclose(out, ref, atol=2e-2, rtol=2e-2), (out, ref)
    print("KERNEL_OK")
</pallas_src>

<mosaic_0001>
module attributes {stable_mosaic.version = 11 : i64} {
  func.func @gru_kernel(%arg0: i32, %arg1: i32, %arg2: memref<16xi32, #tpu.memory_space<smem>>, %arg3: memref<8x8x128xbf16, #tpu.memory_space<vmem>>, %arg4: memref<8x1xi32, #tpu.memory_space<vmem>>, %arg5: memref<128x384xbf16, #tpu.memory_space<vmem>>, %arg6: memref<128x384xbf16, #tpu.memory_space<vmem>>, %arg7: memref<1x384xf32, #tpu.memory_space<vmem>>, %arg8: memref<1x128xf32, #tpu.memory_space<vmem>>, %arg9: memref<1x128xf32, #tpu.memory_space<vmem>>, %arg10: memref<1x1xf32, #tpu.memory_space<vmem>>, %arg11: memref<8x1xf32, #tpu.memory_space<vmem>>, %arg12: memref<8x128xf32, #tpu.memory_space<vmem>>) attributes {dimension_semantics = [#tpu.dimension_semantics<parallel>, #tpu.dimension_semantics<arbitrary>], iteration_bounds = array<i64: 2, 2>, scalar_prefetch = 1 : i64, scratch_operands = 1 : i64, tpu.core_type = #tpu.core_type<tc>, window_params = [{transform_indices = @transform_0, window_bounds = array<i64: 8, 8, 128>}, {transform_indices = @transform_1, window_bounds = array<i64: 8, 1>}, {pipeline_mode = #tpu.pipeline_mode<synchronous>, transform_indices = @transform_2, window_bounds = array<i64: 128, 384>}, {pipeline_mode = #tpu.pipeline_mode<synchronous>, transform_indices = @transform_3, window_bounds = array<i64: 128, 384>}, {pipeline_mode = #tpu.pipeline_mode<synchronous>, transform_indices = @transform_4, window_bounds = array<i64: 1, 384>}, {pipeline_mode = #tpu.pipeline_mode<synchronous>, transform_indices = @transform_5, window_bounds = array<i64: 1, 128>}, {pipeline_mode = #tpu.pipeline_mode<synchronous>, transform_indices = @transform_6, window_bounds = array<i64: 1, 128>}, {pipeline_mode = #tpu.pipeline_mode<synchronous>, transform_indices = @transform_7, window_bounds = array<i64: 1, 1>}, {transform_indices = @transform_8, window_bounds = array<i64: 8, 1>}]} {
    %c0_i32 = arith.constant 0 : i32
    %0 = arith.cmpi eq, %arg1, %c0_i32 : i32
    %1 = arith.extui %0 : i1 to i32
    %c0_i32_0 = arith.constant 0 : i32
    %2 = arith.cmpi ne, %1, %c0_i32_0 : i32
    scf.if %2 {
      %cst = arith.constant 0.000000e+00 : f32
      %13 = vector.broadcast %cst : f32 to vector<8x128xf32>
      %c0 = arith.constant 0 : index
      %c0_4 = arith.constant 0 : index
      %14 = vector.load %arg12[%c0, %c0_4] : memref<8x128xf32, #tpu.memory_space<vmem>>, vector<8x128xf32>
      tpu.vector_store %arg12[%c0, %c0_4], %13 {strides = array<i32>} : memref<8x128xf32, #tpu.memory_space<vmem>>, vector<8x128xf32>,
    } else {
    }
    %c8_i32 = arith.constant 8 : i32
    %3 = arith.muli %arg0, %c8_i32 : i32
    %4 = arith.index_cast %3 : i32 to index
    %5 = memref.load %arg2[%4] : memref<16xi32, #tpu.memory_space<smem>>
    %c8_i32_1 = arith.constant 8 : i32
    %6 = arith.muli %arg1, %c8_i32_1 : i32
    %7 = arith.cmpi slt, %6, %5 : i32
    %8 = arith.extui %7 : i1 to i32
    %c0_i32_2 = arith.constant 0 : i32
    %9 = arith.cmpi ne, %8, %c0_i32_2 : i32
    scf.if %9 {
      %c0 = arith.constant 0 : index
      %c0_4 = arith.constant 0 : index
      %13 = vector.load %arg4[%c0, %c0_4] : memref<8x1xi32, #tpu.memory_space<vmem>>, vector<8x1xi32>
      %c0_5 = arith.constant 0 : index
      %c0_6 = arith.constant 0 : index
      %14 = vector.load %arg7[%c0_5, %c0_6] : memref<1x384xf32, #tpu.memory_space<vmem>>, vector<1x384xf32>
      %15 = vector.shape_cast %14 : vector<1x384xf32> to vector<1x384xf32>
      %16 = vector.broadcast %15 : vector<1x384xf32> to vector<8x384xf32>
      %c0_7 = arith.constant 0 : index
      %c0_8 = arith.constant 0 : index
      %17 = vector.load %arg8[%c0_7, %c0_8] : memref<1x128xf32, #tpu.memory_space<vmem>>, vector<1x128xf32>
      %18 = vector.shape_cast %17 : vector<1x128xf32> to vector<1x128xf32>
      %19 = vector.broadcast %18 : vector<1x128xf32> to vector<8x128xf32>
      %c8_i32_9 = arith.constant 8 : i32
      %20 = arith.muli %arg1, %c8_i32_9 : i32
      %c0_10 = arith.constant 0 : index
      %c0_11 = arith.constant 0 : index
      %21 = vector.load %arg12[%c0_10, %c0_11] : memref<8x128xf32, #tpu.memory_space<vmem>>, vector<8x128xf32>
      %c0_i32_12 = arith.constant 0 : i32
      %22 = arith.index_cast %c0_i32_12 : i32 to index
      %c0_13 = arith.constant 0 : index
      %c0_14 = arith.constant 0 : index
      %23 = vector.load %arg3[%22, %c0_13, %c0_14] : memref<8x8x128xbf16, #tpu.memory_space<vmem>>, vector<1x8x128xbf16>
      %24 = vector.shape_cast %23 : vector<1x8x128xbf16> to vector<8x128xbf16>
      %c0_15 = arith.constant 0 : index
      %c0_16 = arith.constant 0 : index
      %25 = vector.load %arg5[%c0_15, %c0_16] : memref<128x384xbf16, #tpu.memory_space<vmem>>, vector<128x384xbf16>
      %cst = arith.constant dense<0.000000e+00> : vector<8x384xf32>
      %26 = tpu.matmul %24, %25, %cst {dimension_numbers = #tpu.dot_dimension_numbers<[1], [0], [0], [1], [0, 0, 1, 1], [], []>} : vector<8x128xbf16>, vector<128x384xbf16>, vector<8x384xf32> -> vector<8x384xf32>
      %27 = arith.addf %26, %16 : vector<8x384xf32>
      %28 = arith.truncf %21 : vector<8x128xf32> to vector<8x128xbf16>
      %c0_17 = arith.constant 0 : index
      %c0_18 = arith.constant 0 : index
      %29 = vector.load %arg6[%c0_17, %c0_18] : memref<128x384xbf16, #tpu.memory_space<vmem>>, vector<128x384xbf16>
      %cst_19 = arith.constant dense<0.000000e+00> : vector<8x384xf32>
      %30 = tpu.matmul %28, %29, %cst_19 {dimension_numbers = #tpu.dot_dimension_numbers<[1], [0], [0], [1], [0, 0, 1, 1], [], []>} : vector<8x128xbf16>, vector<128x384xbf16>, vector<8x384xf32> -> vector<8x384xf32>
      %31 = vector.extract_strided_slice %27 {offsets = [0, 0], sizes = [8, 128], strides = [1, 1]} : vector<8x384xf32> to vector<8x128xf32>
      %32 = vector.extract_strided_slice %30 {offsets = [0, 0], sizes = [8, 128], strides = [1, 1]} : vector<8x384xf32> to vector<8x128xf32>
      %33 = arith.addf %31, %32 : vector<8x128xf32>
      %34 = arith.negf %33 : vector<8x128xf32>
      %35 = math.exp %34 : vector<8x128xf32>
      %cst_20 = arith.constant 1.000000e+00 : f32
      %36 = vector.broadcast %cst_20 : f32 to vector<8x128xf32>
      %37 = arith.addf %36, %35 : vector<8x128xf32>
      %38 = arith.divf %36, %37 : vector<8x128xf32>
      %39 = vector.extract_strided_slice %27 {offsets = [0, 128], sizes = [8, 128], strides = [1, 1]} : vector<8x384xf32> to vector<8x128xf32>
      %40 = vector.extract_strided_slice %30 {offsets = [0, 128], sizes = [8, 128], strides = [1, 1]} : vector<8x384xf32> to vector<8x128xf32>
      %41 = arith.addf %39, %40 : vector<8x128xf32>
      %42 = arith.negf %41 : vector<8x128xf32>
      %43 = math.exp %42 : vector<8x128xf32>
      %cst_21 = arith.constant 1.000000e+00 : f32
      %44 = vector.broadcast %cst_21 : f32 to vector<8x128xf32>
      %45 = arith.addf %44, %43 : vector<8x128xf32>
      %46 = arith.divf %44, %45 : vector<8x128xf32>
      %47 = vector.extract_strided_slice %27 {offsets = [0, 256], sizes = [8, 128], strides = [1, 1]} : vector<8x384xf32> to vector<8x128xf32>
      %48 = vector.extract_strided_slice %30 {offsets = [0, 256], sizes = [8, 128], strides = [1, 1]} : vector<8x384xf32> to vector<8x128xf32>
      %49 = arith.addf %48, %19 : vector<8x128xf32>
      %50 = arith.mulf %38, %49 : vector<8x128xf32>
      %51 = arith.addf %47, %50 : vector<8x128xf32>
      %52 = math.tanh %51 : vector<8x128xf32>
      %cst_22 = arith.constant 1.000000e+00 : f32
      %53 = vector.broadcast %cst_22 : f32 to vector<8x128xf32>
      %54 = arith.subf %53, %46 : vector<8x128xf32>
      %55 = arith.mulf %54, %52 : vector<8x128xf32>
      %56 = arith.mulf %46, %21 : vector<8x128xf32>
      %57 = arith.addf %55, %56 : vector<8x128xf32>
      %58 = arith.addi %20, %c0_i32_12 : i32
      %59 = vector.broadcast %58 : i32 to vector<8x1xi32>
      %60 = arith.cmpi slt, %59, %13 : vector<8x1xi32>
      %61 = vector.shape_cast %60 : vector<8x1xi1> to vector<8x1xi1>
      %62 = vector.broadcast %61 : vector<8x1xi1> to vector<8x128xi1>
      %63 = arith.select %62, %57, %21 : vector<8x128xi1>, vector<8x128xf32>
      %c1_i32_23 = arith.constant 1 : i32
      %64 = arith.index_cast %c1_i32_23 : i32 to index
      %c0_24 = arith.constant 0 : index
      %c0_25 = arith.constant 0 : index
      %65 = vector.load %arg3[%64, %c0_24, %c0_25] : memref<8x8x128xbf16, #tpu.memory_space<vmem>>, vector<1x8x128xbf16>
      %66 = vector.shape_cast %65 : vector<1x8x128xbf16> to vector<8x128xbf16>
      %c0_26 = arith.constant 0 : index
      %c0_27 = arith.constant 0 : index
      %67 = vector.load %arg5[%c0_26, %c0_27] : memref<128x384xbf16, #tpu.memory_space<vmem>>, vector<128x384xbf16>
      %cst_28 = arith.constant dense<0.000000e+00> : vector<8x384xf32>
      %68 = tpu.matmul %66, %67, %cst_28 {dimension_numbers = #tpu.dot_dimension_numbers<[1], [0], [0], [1], [0, 0, 1, 1], [], []>} : vector<8x128xbf16>, vector<128x384xbf16>, vector<8x384xf32> -> vector<8x384xf32>
      %69 = arith.addf %68, %16 : vector<8x384xf32>
      %70 = arith.truncf %63 : vector<8x128xf32> to vector<8x128xbf16>
      %c0_29 = arith.constant 0 : index
      %c0_30 = arith.constant 0 : index
      %71 = vector.load %arg6[%c0_29, %c0_30] : memref<128x384xbf16, #tpu.memory_space<vmem>>, vector<128x384xbf16>
      %cst_31 = arith.constant dense<0.000000e+00> : vector<8x384xf32>
      %72 = tpu.matmul %70, %71, %cst_31 {dimension_numbers = #tpu.dot_dimension_numbers<[1], [0], [0], [1], [0, 0, 1, 1], [], []>} : vector<8x128xbf16>, vector<128x384xbf16>, vector<8x384xf32> -> vector<8x384xf32>
      %73 = vector.extract_strided_slice %69 {offsets = [0, 0], sizes = [8, 128], strides = [1, 1]} : vector<8x384xf32> to vector<8x128xf32>
      %74 = vector.extract_strided_slice %72 {offsets = [0, 0], sizes = [8, 128], strides = [1, 1]} : vector<8x384xf32> to vector<8x128xf32>
      %75 = arith.addf %73, %74 : vector<8x128xf32>
      %76 = arith.negf %75 : vector<8x128xf32>
      %77 = math.exp %76 : vector<8x128xf32>
      %cst_32 = arith.constant 1.000000e+00 : f32
      %78 = vector.broadcast %cst_32 : f32 to vector<8x128xf32>
      %79 = arith.addf %78, %77 : vector<8x128xf32>
      %80 = arith.divf %78, %79 : vector<8x128xf32>
      %81 = vector.extract_strided_slice %69 {offsets = [0, 128], sizes = [8, 128], strides = [1, 1]} : vector<8x384xf32> to vector<8x128xf32>
      %82 = vector.extract_strided_slice %72 {offsets = [0, 128], sizes = [8, 128], strides = [1, 1]} : vector<8x384xf32> to vector<8x128xf32>
      %83 = arith.addf %81, %82 : vector<8x128xf32>
      %84 = arith.negf %83 : vector<8x128xf32>
      %85 = math.exp %84 : vector<8x128xf32>
      %cst_33 = arith.constant 1.000000e+00 : f32
      %86 = vector.broadcast %cst_33 : f32 to vector<8x128xf32>
      %87 = arith.addf %86, %85 : vector<8x128xf32>
      %88 = arith.divf %86, %87 : vector<8x128xf32>
      %89 = vector.extract_strided_slice %69 {offsets = [0, 256], sizes = [8, 128], strides = [1, 1]} : vector<8x384xf32> to vector<8x128xf32>
      %90 = vector.extract_strided_slice %72 {offsets = [0, 256], sizes = [8, 128], strides = [1, 1]} : vector<8x384xf32> to vector<8x128xf32>
      %91 = arith.addf %90, %19 : vector<8x128xf32>
      %92 = arith.mulf %80, %91 : vector<8x128xf32>
      %93 = arith.addf %89, %92 : vector<8x128xf32>
      %94 = math.tanh %93 : vector<8x128xf32>
      %cst_34 = arith.constant 1.000000e+00 : f32
      %95 = vector.broadcast %cst_34 : f32 to vector<8x128xf32>
      %96 = arith.subf %95, %88 : vector<8x128xf32>
      %97 = arith.mulf %96, %94 : vector<8x128xf32>
      %98 = arith.mulf %88, %63 : vector<8x128xf32>
      %99 = arith.addf %97, %98 : vector<8x128xf32>
      %100 = arith.addi %20, %c1_i32_23 : i32
      %101 = vector.broadcast %100 : i32 to vector<8x1xi32>
      %102 = arith.cmpi slt, %101, %13 : vector<8x1xi32>
      %103 = vector.shape_cast %102 : vector<8x1xi1> to vector<8x1xi1>
      %104 = vector.broadcast %103 : vector<8x1xi1> to vector<8x128xi1>
      %105 = arith.select %104, %99, %63 : vector<8x128xi1>, vector<8x128xf32>
      %c2_i32 = arith.constant 2 : i32
      %106 = arith.index_cast %c2_i32 : i32 to index
      %c0_35 = arith.constant 0 : index
      %c0_36 = arith.constant 0 : index
      %107 = vector.load %arg3[%106, %c0_35, %c0_36] : memref<8x8x128xbf16, #tpu.memory_space<vmem>>, vector<1x8x128xbf16>
      %108 = vector.shape_cast %107 : vector<1x8x128xbf16> to vector<8x128xbf16>
      %c0_37 = arith.constant 0 : index
      %c0_38 = arith.constant 0 : index
      %109 = vector.load %arg5[%c0_37, %c0_38] : memref<128x384xbf16, #tpu.memory_space<vmem>>, vector<128x384xbf16>
      %cst_39 = arith.constant dense<0.000000e+00> : vector<8x384xf32>
      %110 = tpu.matmul %108, %109, %cst_39 {dimension_numbers = #tpu.dot_dimension_numbers<[1], [0], [0], [1], [0, 0, 1, 1], [], []>} : vector<8x128xbf16>, vector<128x384xbf16>, vector<8x384xf32> -> vector<8x384xf32>
      %111 = arith.addf %110, %16 : vector<8x384xf32>
      %112 = arith.truncf %105 : vector<8x128xf32> to vector<8x128xbf16>
      %c0_40 = arith.constant 0 : index
      %c0_41 = arith.constant 0 : index
      %113 = vector.load %arg6[%c0_40, %c0_41] : memref<128x384xbf16, #tpu.memory_space<vmem>>, vector<128x384xbf16>
      %cst_42 = arith.constant dense<0.000000e+00> : vector<8x384xf32>
      %114 = tpu.matmul %112, %113, %cst_42 {dimension_numbers = #tpu.dot_dimension_numbers<[1], [0], [0], [1], [0, 0, 1, 1], [], []>} : vector<8x128xbf16>, vector<128x384xbf16>, vector<8x384xf32> -> vector<8x384xf32>
      %115 = vector.extract_strided_slice %111 {offsets = [0, 0], sizes = [8, 128], strides = [1, 1]} : vector<8x384xf32> to vector<8x128xf32>
      %116 = vector.extract_strided_slice %114 {offsets = [0, 0], sizes = [8, 128], strides = [1, 1]} : vector<8x384xf32> to vector<8x128xf32>
      %117 = arith.addf %115, %116 : vector<8x128xf32>
      %118 = arith.negf %117 : vector<8x128xf32>
      %119 = math.exp %118 : vector<8x128xf32>
      %cst_43 = arith.constant 1.000000e+00 : f32
      %120 = vector.broadcast %cst_43 : f32 to vector<8x128xf32>
      %121 = arith.addf %120, %119 : vector<8x128xf32>
      %122 = arith.divf %120, %121 : vector<8x128xf32>
      %123 = vector.extract_strided_slice %111 {offsets = [0, 128], sizes = [8, 128], strides = [1, 1]} : vector<8x384xf32> to vector<8x128xf32>
      %124 = vector.extract_strided_slice %114 {offsets = [0, 128], sizes = [8, 128], strides = [1, 1]} : vector<8x384xf32> to vector<8x128xf32>
      %125 = arith.addf %123, %124 : vector<8x128xf32>
      %126 = arith.negf %125 : vector<8x128xf32>
      %127 = math.exp %126 : vector<8x128xf32>
      %cst_44 = arith.constant 1.000000e+00 : f32
      %128 = vector.broadcast %cst_44 : f32 to vector<8x128xf32>
      %129 = arith.addf %128, %127 : vector<8x128xf32>
      %130 = arith.divf %128, %129 : vector<8x128xf32>
      %131 = vector.extract_strided_slice %111 {offsets = [0, 256], sizes = [8, 128], strides = [1, 1]} : vector<8x384xf32> to vector<8x128xf32>
      %132 = vector.extract_strided_slice %114 {offsets = [0, 256], sizes = [8, 128], strides = [1, 1]} : vector<8x384xf32> to vector<8x128xf32>
      %133 = arith.addf %132, %19 : vector<8x128xf32>
      %134 = arith.mulf %122, %133 : vector<8x128xf32>
      %135 = arith.addf %131, %134 : vector<8x128xf32>
      %136 = math.tanh %135 : vector<8x128xf32>
      %cst_45 = arith.constant 1.000000e+00 : f32
      %137 = vector.broadcast %cst_45 : f32 to vector<8x128xf32>
      %138 = arith.subf %137, %130 : vector<8x128xf32>
      %139 = arith.mulf %138, %136 : vector<8x128xf32>
      %140 = arith.mulf %130, %105 : vector<8x128xf32>
      %141 = arith.addf %139, %140 : vector<8x128xf32>
      %142 = arith.addi %20, %c2_i32 : i32
      %143 = vector.broadcast %142 : i32 to vector<8x1xi32>
      %144 = arith.cmpi slt, %143, %13 : vector<8x1xi32>
      %145 = vector.shape_cast %144 : vector<8x1xi1> to vector<8x1xi1>
      %146 = vector.broadcast %145 : vector<8x1xi1> to vector<8x128xi1>
      %147 = arith.select %146, %141, %105 : vector<8x128xi1>, vector<8x128xf32>
      %c3_i32 = arith.constant 3 : i32
      %148 = arith.index_cast %c3_i32 : i32 to index
      %c0_46 = arith.constant 0 : index
      %c0_47 = arith.constant 0 : index
      %149 = vector.load %arg3[%148, %c0_46, %c0_47] : memref<8x8x128xbf16, #tpu.memory_space<vmem>>, vector<1x8x128xbf16>
      %150 = vector.shape_cast %149 : vector<1x8x128xbf16> to vector<8x128xbf16>
      %c0_48 = arith.constant 0 : index
      %c0_49 = arith.constant 0 : index
      %151 = vector.load %arg5[%c0_48, %c0_49] : memref<128x384xbf16, #tpu.memory_space<vmem>>, vector<128x384xbf16>
      %cst_50 = arith.constant dense<0.000000e+00> : vector<8x384xf32>
      %152 = tpu.matmul %150, %151, %cst_50 {dimension_numbers = #tpu.dot_dimension_numbers<[1], [0], [0], [1], [0, 0, 1, 1], [], []>} : vector<8x128xbf16>, vector<128x384xbf16>, vector<8x384xf32> -> vector<8x384xf32>
      %153 = arith.addf %152, %16 : vector<8x384xf32>
      %154 = arith.truncf %147 : vector<8x128xf32> to vector<8x128xbf16>
      %c0_51 = arith.constant 0 : index
      %c0_52 = arith.constant 0 : index
      %155 = vector.load %arg6[%c0_51, %c0_52] : memref<128x384xbf16, #tpu.memory_space<vmem>>, vector<128x384xbf16>
      %cst_53 = arith.constant dense<0.000000e+00> : vector<8x384xf32>
      %156 = tpu.matmul %154, %155, %cst_53 {dimension_numbers = #tpu.dot_dimension_numbers<[1], [0], [0], [1], [0, 0, 1, 1], [], []>} : vector<8x128xbf16>, vector<128x384xbf16>, vector<8x384xf32> -> vector<8x384xf32>
      %157 = vector.extract_strided_slice %153 {offsets = [0, 0], sizes = [8, 128], strides = [1, 1]} : vector<8x384xf32> to vector<8x128xf32>
      %158 = vector.extract_strided_slice %156 {offsets = [0, 0], sizes = [8, 128], strides = [1, 1]} : vector<8x384xf32> to vector<8x128xf32>
      %159 = arith.addf %157, %158 : vector<8x128xf32>
      %160 = arith.negf %159 : vector<8x128xf32>
      %161 = math.exp %160 : vector<8x128xf32>
      %cst_54 = arith.constant 1.000000e+00 : f32
      %162 = vector.broadcast %cst_54 : f32 to vector<8x128xf32>
      %163 = arith.addf %162, %161 : vector<8x128xf32>
      %164 = arith.divf %162, %163 : vector<8x128xf32>
      %165 = vector.extract_strided_slice %153 {offsets = [0, 128], sizes = [8, 128], strides = [1, 1]} : vector<8x384xf32> to vector<8x128xf32>
      %166 = vector.extract_strided_slice %156 {offsets = [0, 128], sizes = [8, 128], strides = [1, 1]} : vector<8x384xf32> to vector<8x128xf32>
      %167 = arith.addf %165, %166 : vector<8x128xf32>
      %168 = arith.negf %167 : vector<8x128xf32>
      %169 = math.exp %168 : vector<8x128xf32>
      %cst_55 = arith.constant 1.000000e+00 : f32
      %170 = vector.broadcast %cst_55 : f32 to vector<8x128xf32>
      %171 = arith.addf %170, %169 : vector<8x128xf32>
      %172 = arith.divf %170, %171 : vector<8x128xf32>
      %173 = vector.extract_strided_slice %153 {offsets = [0, 256], sizes = [8, 128], strides = [1, 1]} : vector<8x384xf32> to vector<8x128xf32>
      %174 = vector.extract_strided_slice %156 {offsets = [0, 256], sizes = [8, 128], strides = [1, 1]} : vector<8x384xf32> to vector<8x128xf32>
      %175 = arith.addf %174, %19 : vector<8x128xf32>
      %176 = arith.mulf %164, %175 : vector<8x128xf32>
      %177 = arith.addf %173, %176 : vector<8x128xf32>
      %178 = math.tanh %177 : vector<8x128xf32>
      %cst_56 = arith.constant 1.000000e+00 : f32
      %179 = vector.broadcast %cst_56 : f32 to vector<8x128xf32>
      %180 = arith.subf %179, %172 : vector<8x128xf32>
      %181 = arith.mulf %180, %178 : vector<8x128xf32>
      %182 = arith.mulf %172, %147 : vector<8x128xf32>
      %183 = arith.addf %181, %182 : vector<8x128xf32>
      %184 = arith.addi %20, %c3_i32 : i32
      %185 = vector.broadcast %184 : i32 to vector<8x1xi32>
      %186 = arith.cmpi slt, %185, %13 : vector<8x1xi32>
      %187 = vector.shape_cast %186 : vector<8x1xi1> to vector<8x1xi1>
      %188 = vector.broadcast %187 : vector<8x1xi1> to vector<8x128xi1>
      %189 = arith.select %188, %183, %147 : vector<8x128xi1>, vector<8x128xf32>
      %c4_i32 = arith.constant 4 : i32
      %190 = arith.index_cast %c4_i32 : i32 to index
      %c0_57 = arith.constant 0 : index
      %c0_58 = arith.constant 0 : index
      %191 = vector.load %arg3[%190, %c0_57, %c0_58] : memref<8x8x128xbf16, #tpu.memory_space<vmem>>, vector<1x8x128xbf16>
      %192 = vector.shape_cast %191 : vector<1x8x128xbf16> to vector<8x128xbf16>
      %c0_59 = arith.constant 0 : index
      %c0_60 = arith.constant 0 : index
      %193 = vector.load %arg5[%c0_59, %c0_60] : memref<128x384xbf16, #tpu.memory_space<vmem>>, vector<128x384xbf16>
      %cst_61 = arith.constant dense<0.000000e+00> : vector<8x384xf32>
      %194 = tpu.matmul %192, %193, %cst_61 {dimension_numbers = #tpu.dot_dimension_numbers<[1], [0], [0], [1], [0, 0, 1, 1], [], []>} : vector<8x128xbf16>, vector<128x384xbf16>, vector<8x384xf32> -> vector<8x384xf32>
      %195 = arith.addf %194, %16 : vector<8x384xf32>
      %196 = arith.truncf %189 : vector<8x128xf32> to vector<8x128xbf16>
      %c0_62 = arith.constant 0 : index
      %c0_63 = arith.constant 0 : index
      %197 = vector.load %arg6[%c0_62, %c0_63] : memref<128x384xbf16, #tpu.memory_space<vmem>>, vector<128x384xbf16>
      %cst_64 = arith.constant dense<0.000000e+00> : vector<8x384xf32>
      %198 = tpu.matmul %196, %197, %cst_64 {dimension_numbers = #tpu.dot_dimension_numbers<[1], [0], [0], [1], [0, 0, 1, 1], [], []>} : vector<8x128xbf16>, vector<128x384xbf16>, vector<8x384xf32> -> vector<8x384xf32>
      %199 = vector.extract_strided_slice %195 {offsets = [0, 0], sizes = [8, 128], strides = [1, 1]} : vector<8x384xf32> to vector<8x128xf32>
      %200 = vector.extract_strided_slice %198 {offsets = [0, 0], sizes = [8, 128], strides = [1, 1]} : vector<8x384xf32> to vector<8x128xf32>
      %201 = arith.addf %199, %200 : vector<8x128xf32>
      %202 = arith.negf %201 : vector<8x128xf32>
      %203 = math.exp %202 : vector<8x128xf32>
      %cst_65 = arith.constant 1.000000e+00 : f32
      %204 = vector.broadcast %cst_65 : f32 to vector<8x128xf32>
      %205 = arith.addf %204, %203 : vector<8x128xf32>
      %206 = arith.divf %204, %205 : vector<8x128xf32>
      %207 = vector.extract_strided_slice %195 {offsets = [0, 128], sizes = [8, 128], strides = [1, 1]} : vector<8x384xf32> to vector<8x128xf32>
      %208 = vector.extract_strided_slice %198 {offsets = [0, 128], sizes = [8, 128], strides = [1, 1]} : vector<8x384xf32> to vector<8x128xf32>
      %209 = arith.addf %207, %208 : vector<8x128xf32>
      %210 = arith.negf %209 : vector<8x128xf32>
      %211 = math.exp %210 : vector<8x128xf32>
      %cst_66 = arith.constant 1.000000e+00 : f32
      %212 = vector.broadcast %cst_66 : f32 to vector<8x128xf32>
      %213 = arith.addf %212, %211 : vector<8x128xf32>
      %214 = arith.divf %212, %213 : vector<8x128xf32>
      %215 = vector.extract_strided_slice %195 {offsets = [0, 256], sizes = [8, 128], strides = [1, 1]} : vector<8x384xf32> to vector<8x128xf32>
      %216 = vector.extract_strided_slice %198 {offsets = [0, 256], sizes = [8, 128], strides = [1, 1]} : vector<8x384xf32> to vector<8x128xf32>
      %217 = arith.addf %216, %19 : vector<8x128xf32>
      %218 = arith.mulf %206, %217 : vector<8x128xf32>
      %219 = arith.addf %215, %218 : vector<8x128xf32>
      %220 = math.tanh %219 : vector<8x128xf32>
      %cst_67 = arith.constant 1.000000e+00 : f32
      %221 = vector.broadcast %cst_67 : f32 to vector<8x128xf32>
      %222 = arith.subf %221, %214 : vector<8x128xf32>
      %223 = arith.mulf %222, %220 : vector<8x128xf32>
      %224 = arith.mulf %214, %189 : vector<8x128xf32>
      %225 = arith.addf %223, %224 : vector<8x128xf32>
      %226 = arith.addi %20, %c4_i32 : i32
      %227 = vector.broadcast %226 : i32 to vector<8x1xi32>
      %228 = arith.cmpi slt, %227, %13 : vector<8x1xi32>
      %229 = vector.shape_cast %228 : vector<8x1xi1> to vector<8x1xi1>
      %230 = vector.broadcast %229 : vector<8x1xi1> to vector<8x128xi1>
      %231 = arith.select %230, %225, %189 : vector<8x128xi1>, vector<8x128xf32>
      %c5_i32 = arith.constant 5 : i32
      %232 = arith.index_cast %c5_i32 : i32 to index
      %c0_68 = arith.constant 0 : index
      %c0_69 = arith.constant 0 : index
      %233 = vector.load %arg3[%232, %c0_68, %c0_69] : memref<8x8x128xbf16, #tpu.memory_space<vmem>>, vector<1x8x128xbf16>
      %234 = vector.shape_cast %233 : vector<1x8x128xbf16> to vector<8x128xbf16>
      %c0_70 = arith.constant 0 : index
      %c0_71 = arith.constant 0 : index
      %235 = vector.load %arg5[%c0_70, %c0_71] : memref<128x384xbf16, #tpu.memory_space<vmem>>, vector<128x384xbf16>
      %cst_72 = arith.constant dense<0.000000e+00> : vector<8x384xf32>
      %236 = tpu.matmul %234, %235, %cst_72 {dimension_numbers = #tpu.dot_dimension_numbers<[1], [0], [0], [1], [0, 0, 1, 1], [], []>} : vector<8x128xbf16>, vector<128x384xbf16>, vector<8x384xf32> -> vector<8x384xf32>
      %237 = arith.addf %236, %16 : vector<8x384xf32>
      %238 = arith.truncf %231 : vector<8x128xf32> to vector<8x128xbf16>
      %c0_73 = arith.constant 0 : index
      %c0_74 = arith.constant 0 : index
      %239 = vector.load %arg6[%c0_73, %c0_74] : memref<128x384xbf16, #tpu.memory_space<vmem>>, vector<128x384xbf16>
      %cst_75 = arith.constant dense<0.000000e+00> : vector<8x384xf32>
      %240 = tpu.matmul %238, %239, %cst_75 {dimension_numbers = #tpu.dot_dimension_numbers<[1], [0], [0], [1], [0, 0, 1, 1], [], []>} : vector<8x128xbf16>, vector<128x384xbf16>, vector<8x384xf32> -> vector<8x384xf32>
      %241 = vector.extract_strided_slice %237 {offsets = [0, 0], sizes = [8, 128], strides = [1, 1]} : vector<8x384xf32> to vector<8x128xf32>
      %242 = vector.extract_strided_slice %240 {offsets = [0, 0], sizes = [8, 128], strides = [1, 1]} : vector<8x384xf32> to vector<8x128xf32>
      %243 = arith.addf %241, %242 : vector<8x128xf32>
      %244 = arith.negf %243 : vector<8x128xf32>
      %245 = math.exp %244 : vector<8x128xf32>
      %cst_76 = arith.constant 1.000000e+00 : f32
      %246 = vector.broadcast %cst_76 : f32 to vector<8x128xf32>
      %247 = arith.addf %246, %245 : vector<8x128xf32>
      %248 = arith.divf %246, %247 : vector<8x128xf32>
      %249 = vector.extract_strided_slice %237 {offsets = [0, 128], sizes = [8, 128], strides = [1, 1]} : vector<8x384xf32> to vector<8x128xf32>
      %250 = vector.extract_strided_slice %240 {offsets = [0, 128], sizes = [8, 128], strides = [1, 1]} : vector<8x384xf32> to vector<8x128xf32>
      %251 = arith.addf %249, %250 : vector<8x128xf32>
      %252 = arith.negf %251 : vector<8x128xf32>
      %253 = math.exp %252 : vector<8x128xf32>
      %cst_77 = arith.constant 1.000000e+00 : f32
      %254 = vector.broadcast %cst_77 : f32 to vector<8x128xf32>
      %255 = arith.addf %254, %253 : vector<8x128xf32>
      %256 = arith.divf %254, %255 : vector<8x128xf32>
      %257 = vector.extract_strided_slice %237 {offsets = [0, 256], sizes = [8, 128], strides = [1, 1]} : vector<8x384xf32> to vector<8x128xf32>
      %258 = vector.extract_strided_slice %240 {offsets = [0, 256], sizes = [8, 128], strides = [1, 1]} : vector<8x384xf32> to vector<8x128xf32>
      %259 = arith.addf %258, %19 : vector<8x128xf32>
      %260 = arith.mulf %248, %259 : vector<8x128xf32>
      %261 = arith.addf %257, %260 : vector<8x128xf32>
      %262 = math.tanh %261 : vector<8x128xf32>
      %cst_78 = arith.constant 1.000000e+00 : f32
      %263 = vector.broadcast %cst_78 : f32 to vector<8x128xf32>
      %264 = arith.subf %263, %256 : vector<8x128xf32>
      %265 = arith.mulf %264, %262 : vector<8x128xf32>
      %266 = arith.mulf %256, %231 : vector<8x128xf32>
      %267 = arith.addf %265, %266 : vector<8x128xf32>
      %268 = arith.addi %20, %c5_i32 : i32
      %269 = vector.broadcast %268 : i32 to vector<8x1xi32>
      %270 = arith.cmpi slt, %269, %13 : vector<8x1xi32>
      %271 = vector.shape_cast %270 : vector<8x1xi1> to vector<8x1xi1>
      %272 = vector.broadcast %271 : vector<8x1xi1> to vector<8x128xi1>
      %273 = arith.select %272, %267, %231 : vector<8x128xi1>, vector<8x128xf32>
      %c6_i32 = arith.constant 6 : i32
      %274 = arith.index_cast %c6_i32 : i32 to index
      %c0_79 = arith.constant 0 : index
      %c0_80 = arith.constant 0 : index
      %275 = vector.load %arg3[%274, %c0_79, %c0_80] : memref<8x8x128xbf16, #tpu.memory_space<vmem>>, vector<1x8x128xbf16>
      %276 = vector.shape_cast %275 : vector<1x8x128xbf16> to vector<8x128xbf16>
      %c0_81 = arith.constant 0 : index
      %c0_82 = arith.constant 0 : index
      %277 = vector.load %arg5[%c0_81, %c0_82] : memref<128x384xbf16, #tpu.memory_space<vmem>>, vector<128x384xbf16>
      %cst_83 = arith.constant dense<0.000000e+00> : vector<8x384xf32>
      %278 = tpu.matmul %276, %277, %cst_83 {dimension_numbers = #tpu.dot_dimension_numbers<[1], [0], [0], [1], [0, 0, 1, 1], [], []>} : vector<8x128xbf16>, vector<128x384xbf16>, vector<8x384xf32> -> vector<8x384xf32>
      %279 = arith.addf %278, %16 : vector<8x384xf32>
      %280 = arith.truncf %273 : vector<8x128xf32> to vector<8x128xbf16>
      %c0_84 = arith.constant 0 : index
      %c0_85 = arith.constant 0 : index
      %281 = vector.load %arg6[%c0_84, %c0_85] : memref<128x384xbf16, #tpu.memory_space<vmem>>, vector<128x384xbf16>
      %cst_86 = arith.constant dense<0.000000e+00> : vector<8x384xf32>
      %282 = tpu.matmul %280, %281, %cst_86 {dimension_numbers = #tpu.dot_dimension_numbers<[1], [0], [0], [1], [0, 0, 1, 1], [], []>} : vector<8x128xbf16>, vector<128x384xbf16>, vector<8x384xf32> -> vector<8x384xf32>
      %283 = vector.extract_strided_slice %279 {offsets = [0, 0], sizes = [8, 128], strides = [1, 1]} : vector<8x384xf32> to vector<8x128xf32>
      %284 = vector.extract_strided_slice %282 {offsets = [0, 0], sizes = [8, 128], strides = [1, 1]} : vector<8x384xf32> to vector<8x128xf32>
      %285 = arith.addf %283, %284 : vector<8x128xf32>
      %286 = arith.negf %285 : vector<8x128xf32>
      %287 = math.exp %286 : vector<8x128xf32>
      %cst_87 = arith.constant 1.000000e+00 : f32
      %288 = vector.broadcast %cst_87 : f32 to vector<8x128xf32>
      %289 = arith.addf %288, %287 : vector<8x128xf32>
      %290 = arith.divf %288, %289 : vector<8x128xf32>
      %291 = vector.extract_strided_slice %279 {offsets = [0, 128], sizes = [8, 128], strides = [1, 1]} : vector<8x384xf32> to vector<8x128xf32>
      %292 = vector.extract_strided_slice %282 {offsets = [0, 128], sizes = [8, 128], strides = [1, 1]} : vector<8x384xf32> to vector<8x128xf32>
      %293 = arith.addf %291, %292 : vector<8x128xf32>
      %294 = arith.negf %293 : vector<8x128xf32>
      %295 = math.exp %294 : vector<8x128xf32>
      %cst_88 = arith.constant 1.000000e+00 : f32
      %296 = vector.broadcast %cst_88 : f32 to vector<8x128xf32>
      %297 = arith.addf %296, %295 : vector<8x128xf32>
      %298 = arith.divf %296, %297 : vector<8x128xf32>
      %299 = vector.extract_strided_slice %279 {offsets = [0, 256], sizes = [8, 128], strides = [1, 1]} : vector<8x384xf32> to vector<8x128xf32>
      %300 = vector.extract_strided_slice %282 {offsets = [0, 256], sizes = [8, 128], strides = [1, 1]} : vector<8x384xf32> to vector<8x128xf32>
      %301 = arith.addf %300, %19 : vector<8x128xf32>
      %302 = arith.mulf %290, %301 : vector<8x128xf32>
      %303 = arith.addf %299, %302 : vector<8x128xf32>
      %304 = math.tanh %303 : vector<8x128xf32>
      %cst_89 = arith.constant 1.000000e+00 : f32
      %305 = vector.broadcast %cst_89 : f32 to vector<8x128xf32>
      %306 = arith.subf %305, %298 : vector<8x128xf32>
      %307 = arith.mulf %306, %304 : vector<8x128xf32>
      %308 = arith.mulf %298, %273 : vector<8x128xf32>
      %309 = arith.addf %307, %308 : vector<8x128xf32>
      %310 = arith.addi %20, %c6_i32 : i32
      %311 = vector.broadcast %310 : i32 to vector<8x1xi32>
      %312 = arith.cmpi slt, %311, %13 : vector<8x1xi32>
      %313 = vector.shape_cast %312 : vector<8x1xi1> to vector<8x1xi1>
      %314 = vector.broadcast %313 : vector<8x1xi1> to vector<8x128xi1>
      %315 = arith.select %314, %309, %273 : vector<8x128xi1>, vector<8x128xf32>
      %c7_i32 = arith.constant 7 : i32
      %316 = arith.index_cast %c7_i32 : i32 to index
      %c0_90 = arith.constant 0 : index
      %c0_91 = arith.constant 0 : index
      %317 = vector.load %arg3[%316, %c0_90, %c0_91] : memref<8x8x128xbf16, #tpu.memory_space<vmem>>, vector<1x8x128xbf16>
      %318 = vector.shape_cast %317 : vector<1x8x128xbf16> to vector<8x128xbf16>
      %c0_92 = arith.constant 0 : index
      %c0_93 = arith.constant 0 : index
      %319 = vector.load %arg5[%c0_92, %c0_93] : memref<128x384xbf16, #tpu.memory_space<vmem>>, vector<128x384xbf16>
      %cst_94 = arith.constant dense<0.000000e+00> : vector<8x384xf32>
      %320 = tpu.matmul %318, %319, %cst_94 {dimension_numbers = #tpu.dot_dimension_numbers<[1], [0], [0], [1], [0, 0, 1, 1], [], []>} : vector<8x128xbf16>, vector<128x384xbf16>, vector<8x384xf32> -> vector<8x384xf32>
      %321 = arith.addf %320, %16 : vector<8x384xf32>
      %322 = arith.truncf %315 : vector<8x128xf32> to vector<8x128xbf16>
      %c0_95 = arith.constant 0 : index
      %c0_96 = arith.constant 0 : index
      %323 = vector.load %arg6[%c0_95, %c0_96] : memref<128x384xbf16, #tpu.memory_space<vmem>>, vector<128x384xbf16>
      %cst_97 = arith.constant dense<0.000000e+00> : vector<8x384xf32>
      %324 = tpu.matmul %322, %323, %cst_97 {dimension_numbers = #tpu.dot_dimension_numbers<[1], [0], [0], [1], [0, 0, 1, 1], [], []>} : vector<8x128xbf16>, vector<128x384xbf16>, vector<8x384xf32> -> vector<8x384xf32>
      %325 = vector.extract_strided_slice %321 {offsets = [0, 0], sizes = [8, 128], strides = [1, 1]} : vector<8x384xf32> to vector<8x128xf32>
      %326 = vector.extract_strided_slice %324 {offsets = [0, 0], sizes = [8, 128], strides = [1, 1]} : vector<8x384xf32> to vector<8x128xf32>
      %327 = arith.addf %325, %326 : vector<8x128xf32>
      %328 = arith.negf %327 : vector<8x128xf32>
      %329 = math.exp %328 : vector<8x128xf32>
      %cst_98 = arith.constant 1.000000e+00 : f32
      %330 = vector.broadcast %cst_98 : f32 to vector<8x128xf32>
      %331 = arith.addf %330, %329 : vector<8x128xf32>
      %332 = arith.divf %330, %331 : vector<8x128xf32>
      %333 = vector.extract_strided_slice %321 {offsets = [0, 128], sizes = [8, 128], strides = [1, 1]} : vector<8x384xf32> to vector<8x128xf32>
      %334 = vector.extract_strided_slice %324 {offsets = [0, 128], sizes = [8, 128], strides = [1, 1]} : vector<8x384xf32> to vector<8x128xf32>
      %335 = arith.addf %333, %334 : vector<8x128xf32>
      %336 = arith.negf %335 : vector<8x128xf32>
      %337 = math.exp %336 : vector<8x128xf32>
      %cst_99 = arith.constant 1.000000e+00 : f32
      %338 = vector.broadcast %cst_99 : f32 to vector<8x128xf32>
      %339 = arith.addf %338, %337 : vector<8x128xf32>
      %340 = arith.divf %338, %339 : vector<8x128xf32>
      %341 = vector.extract_strided_slice %321 {offsets = [0, 256], sizes = [8, 128], strides = [1, 1]} : vector<8x384xf32> to vector<8x128xf32>
      %342 = vector.extract_strided_slice %324 {offsets = [0, 256], sizes = [8, 128], strides = [1, 1]} : vector<8x384xf32> to vector<8x128xf32>
      %343 = arith.addf %342, %19 : vector<8x128xf32>
      %344 = arith.mulf %332, %343 : vector<8x128xf32>
      %345 = arith.addf %341, %344 : vector<8x128xf32>
      %346 = math.tanh %345 : vector<8x128xf32>
      %cst_100 = arith.constant 1.000000e+00 : f32
      %347 = vector.broadcast %cst_100 : f32 to vector<8x128xf32>
      %348 = arith.subf %347, %340 : vector<8x128xf32>
      %349 = arith.mulf %348, %346 : vector<8x128xf32>
      %350 = arith.mulf %340, %315 : vector<8x128xf32>
      %351 = arith.addf %349, %350 : vector<8x128xf32>
      %352 = arith.addi %20, %c7_i32 : i32
      %353 = vector.broadcast %352 : i32 to vector<8x1xi32>
      %354 = arith.cmpi slt, %353, %13 : vector<8x1xi32>
      %355 = vector.shape_cast %354 : vector<8x1xi1> to vector<8x1xi1>
      %356 = vector.broadcast %355 : vector<8x1xi1> to vector<8x128xi1>
      %357 = arith.select %356, %351, %315 : vector<8x128xi1>, vector<8x128xf32>
      %c8_i32_101 = arith.constant 8 : i32
      %c0_102 = arith.constant 0 : index
      %c0_103 = arith.constant 0 : index
      %358 = vector.load %arg12[%c0_102, %c0_103] : memref<8x128xf32, #tpu.memory_space<vmem>>, vector<8x128xf32>
      tpu.vector_store %arg12[%c0_102, %c0_103], %357 {strides = array<i32>} : memref<8x128xf32, #tpu.memory_space<vmem>>, vector<8x128xf32>,
    } else {
    }
    %c1_i32 = arith.constant 1 : i32
    %10 = arith.cmpi eq, %arg1, %c1_i32 : i32
    %11 = arith.extui %10 : i1 to i32
    %c0_i32_3 = arith.constant 0 : i32
    %12 = arith.cmpi ne, %11, %c0_i32_3 : i32
    scf.if %12 {
      %c0 = arith.constant 0 : index
      %c0_4 = arith.constant 0 : index
      %13 = vector.load %arg12[%c0, %c0_4] : memref<8x128xf32, #tpu.memory_space<vmem>>, vector<8x128xf32>
      %c0_5 = arith.constant 0 : index
      %c0_6 = arith.constant 0 : index
      %14 = vector.load %arg9[%c0_5, %c0_6] : memref<1x128xf32, #tpu.memory_space<vmem>>, vector<1x128xf32>
      %15 = vector.shape_cast %14 : vector<1x128xf32> to vector<1x128xf32>
      %16 = vector.broadcast %15 : vector<1x128xf32> to vector<8x128xf32>
      %17 = arith.mulf %13, %16 : vector<8x128xf32>
      %cst = arith.constant dense<0.000000e+00> : vector<8xf32>
      %18 = vector.multi_reduction <add>, %17, %cst [1] : vector<8x128xf32> to vector<8xf32>
      %19 = vector.shape_cast %18 : vector<8xf32> to vector<8x1xf32>
      %c0_7 = arith.constant 0 : index
      %c0_8 = arith.constant 0 : index
      %20 = vector.load %arg10[%c0_7, %c0_8] : memref<1x1xf32, #tpu.memory_space<vmem>>, vector<1x1xf32>
      %21 = vector.broadcast %20 : vector<1x1xf32> to vector<8x1xf32>
      %22 = arith.addf %19, %21 : vector<8x1xf32>
      %c0_9 = arith.constant 0 : index
      %c0_10 = arith.constant 0 : index
      %23 = vector.load %arg11[%c0_9, %c0_10] : memref<8x1xf32, #tpu.memory_space<vmem>>, vector<8x1xf32>
      tpu.vector_store %arg11[%c0_9, %c0_10], %22 {strides = array<i32>} : memref<8x1xf32, #tpu.memory_space<vmem>>, vector<8x1xf32>,
    } else {
    }
    return
  }
  func.func @transform_0(%arg0: i32, %arg1: i32, %arg2: memref<16xi32, #tpu.memory_space<smem>>) -> (i32, i32, i32) {
    %c0_i32 = arith.constant 0 : i32
    %c0_i32_0 = arith.constant 0 : i32
    return %arg1, %arg0, %c0_i32 : i32, i32, i32
  }
  func.func @transform_1(%arg0: i32, %arg1: i32, %arg2: memref<16xi32, #tpu.memory_space<smem>>) -> (i32, i32) {
    %c0_i32 = arith.constant 0 : i32
    %c0_i32_0 = arith.constant 0 : i32
    return %arg0, %c0_i32 : i32, i32
  }
  func.func @transform_2(%arg0: i32, %arg1: i32, %arg2: memref<16xi32, #tpu.memory_space<smem>>) -> (i32, i32) {
    %c0_i32 = arith.constant 0 : i32
    %c0_i32_0 = arith.constant 0 : i32
    %c0_i32_1 = arith.constant 0 : i32
    return %c0_i32, %c0_i32_0 : i32, i32
  }
  func.func @transform_3(%arg0: i32, %arg1: i32, %arg2: memref<16xi32, #tpu.memory_space<smem>>) -> (i32, i32) {
    %c0_i32 = arith.constant 0 : i32
    %c0_i32_0 = arith.constant 0 : i32
    %c0_i32_1 = arith.constant 0 : i32
    return %c0_i32, %c0_i32_0 : i32, i32
  }
  func.func @transform_4(%arg0: i32, %arg1: i32, %arg2: memref<16xi32, #tpu.memory_space<smem>>) -> (i32, i32) {
    %c0_i32 = arith.constant 0 : i32
    %c0_i32_0 = arith.constant 0 : i32
    %c0_i32_1 = arith.constant 0 : i32
    return %c0_i32, %c0_i32_0 : i32, i32
  }
  func.func @transform_5(%arg0: i32, %arg1: i32, %arg2: memref<16xi32, #tpu.memory_space<smem>>) -> (i32, i32) {
    %c0_i32 = arith.constant 0 : i32
    %c0_i32_0 = arith.constant 0 : i32
    %c0_i32_1 = arith.constant 0 : i32
    return %c0_i32, %c0_i32_0 : i32, i32
  }
  func.func @transform_6(%arg0: i32, %arg1: i32, %arg2: memref<16xi32, #tpu.memory_space<smem>>) -> (i32, i32) {
    %c0_i32 = arith.constant 0 : i32
    %c0_i32_0 = arith.constant 0 : i32
    %c0_i32_1 = arith.constant 0 : i32
    return %c0_i32, %c0_i32_0 : i32, i32
  }
  func.func @transform_7(%arg0: i32, %arg1: i32, %arg2: memref<16xi32, #tpu.memory_space<smem>>) -> (i32, i32) {
    %c0_i32 = arith.constant 0 : i32
    %c0_i32_0 = arith.constant 0 : i32
    %c0_i32_1 = arith.constant 0 : i32
    return %c0_i32, %c0_i32_0 : i32, i32
  }
  func.func @transform_8(%arg0: i32, %arg1: i32, %arg2: memref<16xi32, #tpu.memory_space<smem>>) -> (i32, i32) {
    %c0_i32 = arith.constant 0 : i32
    %c0_i32_0 = arith.constant 0 : i32
    return %arg0, %c0_i32 : i32, i32
  }
}

</mosaic_0001>

<bundles_post_ra>
// kernel: rnn_forward.1
= control target key start
LH: loop header
LB: loop body
LE: loop exit
PB: predicated region body
PF: predicated region fallthrough
CT: control target
= control target key end

     0   :  { %s4711_s0 = inlined_call_operand.vmem [shape: s32[16], index: 0, kind: input, shape index: {}]   ;;  %s4712_s1 = inlined_call_operand.vmem [shape: bf16[16,16,128], index: 1, kind: input, shape index: {}]   ;;  %s4713_s2 = inlined_call_operand.vmem [shape: s32[16,1], index: 2, kind: input, shape index: {}]   ;;  %s4714_s3 = inlined_call_operand.vmem [shape: bf16[128,384], index: 3, kind: input, shape index: {}]   ;;  %s4715_s4 = inlined_call_operand.vmem [shape: bf16[128,384], index: 4, kind: input, shape index: {}]   ;;  %s4716_s5 = inlined_call_operand.vmem [shape: f32[1,384], index: 5, kind: input, shape index: {}]   ;;  %s4717_s6 = inlined_call_operand.vmem [shape: f32[1,128], index: 6, kind: input, shape index: {}]   ;;  %s4718_s7 = inlined_call_operand.vmem [shape: f32[1,128], index: 7, kind: input, shape index: {}]   ;;  %s4719_s9 = inlined_call_operand.vmem [shape: f32[16,1], index: 9, kind: output, shape index: {}]   ;;  %s4720_s8 = inlined_call_operand.<no memory space> [shape: f32[1,1], index: 8, kind: input, shape index: {}]  }
   0x1   :  { %s14_s11 = sshll.u32 %s4711_s0, 4  ;;  %v18_v0 = vstv %s4720_s8  ;;  %s15_s11 = int_to_ptr.vmem [resolvable:$true] %s14_s11 }
   0x2   :  { %19 = vst [vmem:[#allocation5] sm:$0x1] %v18_v0  ;;  %s3268_s14 = scalar_lea.vmem %s15_s11, 16  ;;  %p3273_p1 = scmp.lt.s32.totalorder %s15_s11, %s15_s11 }
   0x3   :  { %p3269_p0 = scmp.ne.s32.totalorder %s15_s11, %s3268_s14  ;;  %p3274_p2 = scmp.lt.s32.totalorder %s3268_s14, %s3268_s14 }
   0x5   :  { %p3275_p3 = por %p3274_p2, %p3273_p1 }
   0x7   :  { %p3276_p4 = pnand %p3275_p3, %p3269_p0 }
   0x9   :  { %3279 = shalt.err (!%p3276_p4)  }
   0xa   :  { %s3338_s15 = smov [#allocation4]  }
   0xb   :  { %17 = dma.vmem_to_smem %s15_s11, 16, %s3338_s15, [#allocation3] }
   0xc   :  { %3308 = dma.done.wait [#allocation3], 16 }
   0xd   :  { %3309 = vsyncadd [#allocation3], 4294967280 }
   0xe   :  { %21 = sfence }
   0xf   :  { %s3399_s16 = smov 0   ;;  %s3401_s0 = smov 0  }
  0x10   :  { %s3403_s17 = smov 0   ;;  %s3405_s8 = smov 0  }
  0x11   :  { %s3407_s18 = smov 0   ;;  %s3409_s19 = smov 0  }
  0x12   :  { %s3411_s20 = smov 0  }
  0x13 LB: > { %s36_s21 = sadd.s32 1, %s3328_s18  ;;  %s39_s22 = sadd.s32 1, %s3332_s19  ;;  %s3336_s20 = sphi %s3411_s20, %s27_s20   ;;  %s3332_s19 = sphi %s3409_s19, %s4837_s19   ;;  %s3328_s18 = sphi %s3407_s18, %s4836_s18   ;;  %s3324_s8 = sphi %s3405_s8, %s4835_s8   ;;  %s3320_s17 = sphi %s3403_s17, %s4834_s17   ;;  %s3316_s0 = sphi %s3401_s0, %s4833_s0   ;;  %s3312_s16 = sphi %s3399_s16, %s4832_s16  }
  0x14   : > { %p37_p5 = scmp.ge.s32.totalorder %s36_s21, 2  ;;  %p55_p6 = scmp.ne.s32.totalorder %s3316_s0, %s3312_s16 }
  0x15   : > { %p56_p7 = scmp.eq.s32.totalorder %s3336_s20, 0  ;;  %s48_s26 = sadd.s32 1, %s3316_s0 }
  0x16   : > { %s4839_s21 = smov (%p37_p5, %s36_s21), 0  ;;  %s4841_s22 = smov (!%p37_p5, %s39_s22), %s3332_s19 }
  0x17   : > { %p57_p8 = por %p56_p7, %p55_p6  ;;  %p41_p9 = scmp.ge.s32.totalorder %s4841_s22, 2 }
  0x18   : > { %s43_s23 = ssub.s32 %s3328_s18, %s4839_s21  ;;  %p2457_p11 = scmp.ge.s32.totalorder %s3336_s20, 4 }
  0x19   : > { %s4843_s22 = smov (%p41_p9, %s4841_s22), 0 }
  0x1a   : > { %s44_s24 = ssub.s32 %s3332_s19, %s4843_s22  ;;  %277 = sbr.rel (%p2457_p11) target bundleno = 42 (0x2a), region = 40 }
  0x1b   : > { %s45_s25 = sor.u32 %s44_s24, %s43_s23 }
  0x1c   : > { %p46_p10 = scmp.eq.s32.totalorder %s45_s25, 0 }
  0x1e   : > { %s3450_s27 = scalar_select %p46_p10, %s3316_s0, %s48_s26  }
  0x1f   : > { %280 = sbr.rel (!%p57_p8) target bundleno = 42 (0x2a), region = 44  ;;  %s282_s28 = sand.u32 (%p57_p8), 1, %s3316_s0  }
  0x20   : > { %s2547_s29 = sshll.u32 (%p57_p8), %s3328_s18, 4  ;;  %s2458_s30 = sshll.u32 (%p57_p8), %s282_s28, 5 }
  0x21   : > { %s287_s10 = sadd.s32 (%p57_p8), %s3332_s19, %s2547_s29  ;;  %s284_s15 = scalar_lea.vmem (%p57_p8), [#allocation6], %s2458_s30 }
  0x22   : > { %s2461_s11 = sshll.u32 (%p57_p8), %s287_s10, 2 }
  0x23   : > { %s289_s14 = scalar_lea.vmem (%p57_p8), %s4712_s1, %s2461_s11 }
  0x24   : > { %v306_v1 = vld [vmem:[%s289_s14] sm:$0xf]  ;;  %v308_v2 = vld [vmem:[%s289_s14 + $0x8] sm:$0xf]  ;;  %v310_v3 = vld [vmem:[%s289_s14 + $0x10] sm:$0xf] }
  0x25   : > { %307 = vst [vmem:[%s284_s15] sm:$0xf] %v306_v1  ;;  %309 = vst [vmem:[%s284_s15 + $0x4] sm:$0xf] %v308_v2  ;;  %v312_v4 = vld [vmem:[%s289_s14 + $0x18] sm:$0xf] }
  0x26   : > { %311 = vst [vmem:[%s284_s15 + $0x8] sm:$0xf] %v310_v3  ;;  %v314_v5 = vld [vmem:[%s289_s14 + $0x20] sm:$0xf]  ;;  %v316_v6 = vld [vmem:[%s289_s14 + $0x28] sm:$0xf] }
  0x27   : > { %313 = vst [vmem:[%s284_s15 + $0xc] sm:$0xf] %v312_v4  ;;  %315 = vst [vmem:[%s284_s15 + $0x10] sm:$0xf] %v314_v5  ;;  %v318_v7 = vld [vmem:[%s289_s14 + $0x30] sm:$0xf] }
  0x28   : > { %317 = vst [vmem:[%s284_s15 + $0x14] sm:$0xf] %v316_v6  ;;  %v320_v8 = vld [vmem:[%s289_s14 + $0x38] sm:$0xf]  ;;  %319 = vst [vmem:[%s284_s15 + $0x18] sm:$0xf] %v318_v7 }
  0x29   : > { %321 = vst [vmem:[%s284_s15 + $0x1c] sm:$0xf] %v320_v8 }
  0x2a PF: > { %p2462_p12 = scmp.ge.s32.totalorder %s3336_s20, 1  ;;  %p367_p13 = scmp.lt.s32.totalorder %s3336_s20, 5 }
  0x2c   : > { %p368_p0 = pnand %p2462_p12, %p367_p13 }
  0x2d   : > { %s374_s23 = sand.u32 (!%p368_p0), 1, %s3312_s16   ;;  %p411_p1 = scmp.lt.s32.totalorder (!%p368_p0), %s3324_s8, 1 }
  0x2e   : > { %371 = sbr.rel (%p368_p0) target bundleno = 2306 (0x902), region = 89  ;;  %s2463_s24 = sshll.u32 (!%p368_p0), %s374_s23, 5 }
  0x2f   : > { %s3474_s13 = scalar_lea.vmem (!%p368_p0), [#allocation6], %s2463_s24  ;;  %p2466_p2 = scmp.ne.s32.totalorder (!%p368_p0), %s3320_s17, 0 }
  0x33   : > { %s412_s25 = scalar_select %p411_p1, %s3324_s8, 1 }
  0x34   : > { %423 = sbr.rel (%p2466_p2) target bundleno = 59 (0x3b), region = 97 }
  0x35   : > { %s2464_s26 = sshll.u32 %s412_s25, 3 }
  0x36   : > { %s3467_s30 = scalar_lea.vmem %s4713_s2, %s2464_s26  ;;  %s3472_s12 = scalar_lea.vmem %s4719_s9, %s2464_s26 }
  0x39   : > { %v3339_v9 = vmov 0.0  }
  0x3a   : > { %424 = vst [vmem:[#allocation2] sm:$0xff] %v3339_v9 }
  0x3b PF: > { %s2467_s16 = sshll.u32 %s3324_s8, 3  ;;  %s3479_s14 = sshll.u32 %s3320_s17, 3 }
  0x3c   : > { %s426_s15 = sld [smem:[#allocation4 + %s2467_s16]] }
  0x42   : > { %p2469_p3 = scmp.ge.s32.totalorder %s3479_s14, %s426_s15 }
  0x44   : > { %431 = sbr.rel (%p2469_p3) target bundleno = 2154 (0x86a), region = 101 }
  0x49   : > { %v3485_v10 = vld [vmem:[%s4714_s3 + $0xac] ss:$12 sps:$4 sm:$0xff]   ;;  %v3490_v11 = vld [vmem:[%s4714_s3 + $0xa8] ss:$12 sps:$4 sm:$0xff]   ;;  %v4725_v12 = vmov 0.0   ;;  %v4721_v13 = vmov 0   ;;  %v964_v42 = vstv %s3479_s14 }
  0x4a   : > { %4768 = vst [vmem:[#allocation8_spill] sm:$0xff] %v3485_v10  ;;  %2692 = vmatprep.subr.bf16.mxu1 %v4725_v12  ;;  %651 = vmatprep.mubr.bf16.mxu0 %v4721_v13  ;;  %v3498_v14 = vld [vmem:[%s4714_s3 + $0x94] ss:$12 sps:$4 sm:$0xff]   ;;  %vm3342_vm0 = vmmov 0   ;;  %v3506_v15 = vld [vmem:[%s4714_s3 + $0x90] ss:$12 sps:$4 sm:$0xff]  }
  0x4b   : > { %619 = vmatprep.subr.bf16.mxu0 %v3485_v10  ;;  %2708 = vmatprep.mubr.msk.bf16.mxu1 %vm3342_vm0, %v4725_v12  ;;  %v3513_v16 = vld [vmem:[%s4714_s3 + $0x7c] ss:$12 sps:$4 sm:$0xff]   ;;  %v3520_v17 = vld [vmem:[%s4714_s3 + $0x78] ss:$12 sps:$4 sm:$0xff]   ;;  %v3537_v20 = vld [vmem:[%s4714_s3 + $0x60] ss:$12 sps:$4 sm:$0xff]  }
  0x4c   : > { %620 = vmatpush1.bf16.msra.mxu0 %v3490_v11  ;;  %3073 = vset.pattern.permute.xlu0 %v4721_v13  ;;  %v3526_v18 = vld [vmem:[%s4714_s3 + $0x64] ss:$12 sps:$4 sm:$0xff]   ;;  %v3543_v21 = vld [vmem:[%s4714_s3 + $0x4c] ss:$12 sps:$4 sm:$0xff]   ;;  %v3556_v23 = vld [vmem:[%s4714_s3 + $0x48] ss:$12 sps:$4 sm:$0xff]  }
  0x4d   : > { %621 = vmatprep.subr.bf16.mxu0 %v3498_v14  ;;  %3074 = vset.pattern.permute.xlu1 %v4721_v13  ;;  %v3531_v19 = vld [vmem:[%s4714_s3 + $0xb0] ss:$12 sps:$4 sm:$0xff]   ;;  %v3549_v22 = vld [vmem:[%s4714_s3 + $0x98] ss:$12 sps:$4 sm:$0xff]   ;;  %v3562_v24 = vld [vmem:[%s4714_s3 + $0x34] ss:$12 sps:$4 sm:$0xff]  }
  0x4e   : > { %2693 = vmatpush3.bf16.msra.mxu1 %v3531_v19  ;;  %v3568_v25 = vld [vmem:[%s4714_s3 + $0x80] ss:$12 sps:$4 sm:$0xff]   ;;  %v3574_v26 = vld [vmem:[%s4714_s3 + $0x30] ss:$12 sps:$4 sm:$0xff]   ;;  %v3587_v28 = vld [vmem:[%s4714_s3 + $0x68] ss:$12 sps:$4 sm:$0xff]  }
  0x4f   : > { %2694 = vmatprep.subr.bf16.mxu1 %v4725_v12  ;;  %v3580_v27 = vld [vmem:[%s4714_s3 + $0x1c] ss:$12 sps:$4 sm:$0xff]   ;;  %v3594_v29 = vld [vmem:[%s4714_s3 + $0x18] ss:$12 sps:$4 sm:$0xff]   ;;  %v3612_v32 = vld [vmem:[%s4714_s3] ss:$12 sps:$4 sm:$0xff]  }
  0x50   : > { %622 = vmatpush1.bf16.msra.mxu0 %v3506_v15  ;;  %v3599_v30 = vld [vmem:[%s4714_s3 + $0x4] ss:$12 sps:$4 sm:$0xff]   ;;  %v3618_v33 = vld [vmem:[%s4715_s4 + $0xac] ss:$12 sps:$4 sm:$0xff]   ;;  %v3633_v36 = vld [vmem:[%s4715_s4 + $0xa8] ss:$12 sps:$4 sm:$0xff]  }
  0x51   : > { %623 = vmatprep.subr.bf16.mxu0 %v3513_v16  ;;  %v3606_v31 = vld [vmem:[%s4714_s3 + $0x50] ss:$12 sps:$4 sm:$0xff]   ;;  %v3625_v34 = vld [vmem:[%s4714_s3 + $0x38] ss:$12 sps:$4 sm:$0xff]   ;;  %v458_v35 = vld [vmem:[%s3474_s13] sm:$0xf] }
  0x52   : > { %2695 = vmatpush3.bf16.msra.mxu1 %v3549_v22  ;;  %v3638_v37 = vld [vmem:[%s4715_s4 + $0x94] ss:$12 sps:$4 sm:$0xff]   ;;  %s1159_s11 = sadd.s32 1, %s3479_s14  ;;  %v3652_v39 = vld [vmem:[%s4715_s4 + $0x90] ss:$12 sps:$4 sm:$0xff]   ;;  %s1747_s8 = sadd.s32 4, %s3479_s14 }
  0x53   : > { %2696 = vmatprep.subr.bf16.mxu1 %v4725_v12  ;;  %v3645_v38 = vld [vmem:[%s4714_s3 + $0x20] ss:$12 sps:$4 sm:$0xff]   ;;  %v3658_v40 = vld [vmem:[%s4715_s4 + $0x7c] ss:$12 sps:$4 sm:$0xff]   ;;  %v1160_v43 = vstv %s1159_s11  ;;  %v3678_v45 = vld [vmem:[%s4715_s4 + $0x78] ss:$12 sps:$4 sm:$0xff]  }
  0x54   : > { %624 = vmatpush1.bf16.msra.mxu0 %v3520_v17  ;;  %v3666_v41 = vld [vmem:[%s4714_s3 + $0x8] ss:$12 sps:$4 sm:$0xff]   ;;  %v3671_v44 = vld [vmem:[%s3467_s30] sm:$0xff]  ;;  %v3691_v47 = vld [vmem:[%s4715_s4 + $0xb0] ss:$12 sps:$4 sm:$0xff]   ;;  %v1748_v49 = vstv %s1747_s8  ;;  %s2139_s15 = sadd.s32 6, %s3479_s14 }
  0x55   : > { %625 = vmatprep.subr.bf16.mxu0 %v3526_v18  ;;  %4769 = vst [vmem:[#allocation9_spill] sm:$0xff] %v3671_v44  ;;  %vm965_vm1 = vcmp.lt.s32.totalorder %v964_v42, %v3671_v44  ;;  %v3685_v46 = vld [vmem:[%s4715_s4 + $0x64] ss:$12 sps:$4 sm:$0xff]   ;;  %vm1161_vm2 = vcmp.lt.s32.totalorder %v1160_v43, %v3671_v44  ;;  %v3701_v50 = vld [vmem:[%s4715_s4 + $0x60] ss:$12 sps:$4 sm:$0xff]   ;;  %vm1749_vm3 = vcmp.lt.s32.totalorder %v1748_v49, %v3671_v44  ;;  %v2140_v54 = vstv %s2139_s15  ;;  %s1355_s23 = sadd.s32 2, %s3479_s14 }
  0x56   : > { %2697 = vmatpush3.bf16.msra.mxu1 %v3568_v25  ;;  %v966_v48 = vsel %vm965_vm1, 1, %v4721_v13  ;;  %v1162_v51 = vsel %vm1161_vm2, 1, %v4721_v13  ;;  %v3708_v52 = vld [vmem:[%s4715_s4 + $0x4c] ss:$12 sps:$4 sm:$0xff]   ;;  %v3724_v55 = vld [vmem:[%s4715_s4 + $0x48] ss:$12 sps:$4 sm:$0xff]   ;;  %vm2141_vm4 = vcmp.lt.s32.totalorder %v2140_v54, %v3671_v44  ;;  %v435_v54 = vlaneseq }
  0x57   : > { %2698 = vmatprep.subr.bf16.mxu1 %v4725_v12  ;;  %968 = vperm.xlu0 %3073, %v966_v48   ;;  %v3714_v53 = vld [vmem:[%s4715_s4 + $0x98] ss:$12 sps:$4 sm:$0xff]   ;;  %v1750_v56 = vsel %vm1749_vm3, 1, %v4721_v13  ;;  %v3731_v57 = vld [vmem:[%s4715_s4 + $0x34] ss:$12 sps:$4 sm:$0xff]   ;;  %v2142_v60 = vsel %vm2141_vm4, 1, %v4721_v13 }
  0x58   : > { %626 = vmatpush1.bf16.msra.mxu0 %v3537_v20  ;;  %4770 = vst [vmem:[#allocation10_spill] sm:$0xff] %v3731_v57  ;;  %v3737_v58 = vld [vmem:[%s4715_s4 + $0x80] ss:$12 sps:$4 sm:$0xff]   ;;  %v3745_v59 = vld [vmem:[%s4715_s4 + $0x30] ss:$12 sps:$4 sm:$0xff]   ;;  %s1551_s25 = sadd.s32 3, %s3479_s14 }
  0x59   : > { %627 = vmatprep.subr.bf16.mxu0 %v3543_v21  ;;  %4771 = vst [vmem:[#allocation11_spill] sm:$0xff] %v3745_v59  ;;  %v3752_v61 = vld [vmem:[%s4715_s4 + $0x1c] ss:$12 sps:$4 sm:$0xff]   ;;  %v3765_v63 = vld [vmem:[%s4715_s4 + $0x18] ss:$12 sps:$4 sm:$0xff]   ;;  %s1943_s24 = sadd.s32 5, %s3479_s14 }
  0x5a   : > { %2699 = vmatpush3.bf16.msra.mxu1 %v3587_v28  ;;  %4772 = vst [vmem:[#allocation12_spill] sm:$0xff] %v3752_v61  ;;  %v3758_v62 = vld [vmem:[%s4715_s4 + $0x68] ss:$12 sps:$4 sm:$0xff]   ;;  %4773 = vst [vmem:[#allocation13_spill] sm:$0xff] %v3765_v63  ;;  %v3771_v0 = vld [vmem:[%s4715_s4 + $0x4] ss:$12 sps:$4 sm:$0xff]  }
  0x5b   : > { %2700 = vmatprep.subr.bf16.mxu1 %v4725_v12  ;;  %1164 = vperm.xlu0 %3073, %v1162_v51   ;;  %4774 = vst [vmem:[#allocation14_spill] sm:$0xff] %v3771_v0  ;;  %v3777_v1 = vld [vmem:[%s4715_s4 + $0x50] ss:$12 sps:$4 sm:$0xff]   ;;  %v3784_v2 = vld [vmem:[%s4715_s4] ss:$12 sps:$4 sm:$0xff]   ;;  %s2335_s26 = sadd.s32 7, %s3479_s14 }
  0x5c   : > { %628 = vmatpush1.bf16.msra.mxu0 %v3556_v23  ;;  %4775 = vst [vmem:[#allocation15_spill] sm:$0xff] %v3784_v2  ;;  %v3786_v3 = vld [vmem:[#allocation2] sm:$0xff]  ;;  %v3813_v7 = vld [vmem:[%s4715_s4 + $0x8] ss:$12 sps:$4 sm:$0xff]   ;;  %v2521_v8 = vld [vmem:[%s3474_s13 + $0x4] sm:$0xf] }
  0x5d   : > { %629 = vmatprep.subr.bf16.mxu0 %v3562_v24  ;;  %v3793_v4 = vld [vmem:[%s4715_s4 + $0x38] ss:$12 sps:$4 sm:$0xff]   ;;  %v700_v5 = vpack.c.bf16 %v3786_v3, %v3786_v3  ;;  %v3803_v6 = vld [vmem:[%s4715_s4 + $0x20] ss:$12 sps:$4 sm:$0xff]   ;;  %4778 = vst [vmem:[#allocation18_spill] sm:$0xff] %v3813_v7 }
  0x5e   : > { %2701 = vmatpush3.bf16.msra.mxu1 %v3606_v31  ;;  %4776 = vst [vmem:[#allocation16_spill] sm:$0xff] %v3793_v4  ;;  %4777 = vst [vmem:[#allocation17_spill] sm:$0xff] %v3803_v6 }
  0x5f   : > { %2702 = vmatprep.subr.bf16.mxu1 %v4725_v12  ;;  %1752 = vperm.xlu0 %3073, %v1750_v56  }
  0x60   : > { %630 = vmatpush1.bf16.msra.mxu0 %v3574_v26 }
  0x61   : > { %631 = vmatprep.subr.bf16.mxu0 %v3580_v27 }
  0x62   : > { %2703 = vmatpush3.bf16.msra.mxu1 %v3625_v34 }
  0x63   : > { %2704 = vmatprep.subr.bf16.mxu1 %v4725_v12  ;;  %2144 = vperm.xlu0 %3073, %v2142_v60   ;;  %v436_v60 = vshrl.u32 %v435_v54, 7 }
  0x64   : > { %632 = vmatpush1.bf16.msra.mxu0 %v3594_v29 }
  0x65   : > { %633 = vmatprep.subr.bf16.mxu0 %v3599_v30  ;;  %v441_v44 = vsub.s32 1, %v436_v60 }
  0x66   : > { %2705 = vmatpush3.bf16.msra.mxu1 %v3645_v38 }
  0x67   : > { %2706 = vmatprep.subr.bf16.mxu1 %v4725_v12 }
  0x68   : > { %634 = vmatpush1.bf16.msra.mxu0 %v3612_v32 }
  0x69   : > { %861 = vmatprep.subr.bf16.mxu0 %v3618_v33 }
  0x6a   : > { %2707 = vmatpush3.bf16.msra.mxu1 %v3666_v41 }
  0x6b   : > { %652 = vmatmul.mubr.bf16.vlgmr.msra.gmra.mxu0 %v458_v35  ;;  %2712 = vmatprep.subr.bf16.mxu1 %v4725_v12 }
  0x6c   : > { %862 = vmatpush1.bf16.msra.mxu0 %v3633_v36  ;;  %893 = vmatprep.mubr.bf16.mxu0 %v4721_v13 }
  0x6d   : > { %863 = vmatprep.subr.bf16.mxu0 %v3638_v37  ;;  %2709 = vmatmul.mubr.bf16.vlgmr.msra.gmra.mxu1 %v458_v35 }
  0x6e   : > { %2713 = vmatpush3.bf16.msra.mxu1 %v3691_v47  ;;  %2728 = vmatprep.mubr.msk.bf16.mxu1 %vm3342_vm0, %v4725_v12 }
  0x6f   : > { %2714 = vmatprep.subr.bf16.mxu1 %v4725_v12 }
  0x70   : > { %864 = vmatpush1.bf16.msra.mxu0 %v3652_v39 }
  0x71   : > { %865 = vmatprep.subr.bf16.mxu0 %v3658_v40 }
  0x72   : > { %2715 = vmatpush3.bf16.msra.mxu1 %v3714_v53 }
  0x73   : > { %2716 = vmatprep.subr.bf16.mxu1 %v4725_v12 }
  0x74   : > { %866 = vmatpush1.bf16.msra.mxu0 %v3678_v45 }
  0x75   : > { %867 = vmatprep.subr.bf16.mxu0 %v3685_v46 }
  0x76   : > { %2717 = vmatpush3.bf16.msra.mxu1 %v3737_v58 }
  0x77   : > { %2718 = vmatprep.subr.bf16.mxu1 %v4725_v12 }
  0x78   : > { %868 = vmatpush1.bf16.msra.mxu0 %v3701_v50 }
  0x79   : > { %869 = vmatprep.subr.bf16.mxu0 %v3708_v52 }
  0x7a   : > { %2719 = vmatpush3.bf16.msra.mxu1 %v3758_v62 }
  0x7b   : > { %2720 = vmatprep.subr.bf16.mxu1 %v4725_v12 }
  0x7c   : > { %870 = vmatpush1.bf16.msra.mxu0 %v3724_v55 }
  0x7d   : > { %871 = vmatprep.subr.bf16.mxu0 %v3731_v57 }
  0x7e   : > { %2721 = vmatpush3.bf16.msra.mxu1 %v3777_v1 }
  0x7f   : > { %2722 = vmatprep.subr.bf16.mxu1 %v4725_v12 }
  0x80   : > { %872 = vmatpush1.bf16.msra.mxu0 %v3745_v59 }
  0x81   : > { %873 = vmatprep.subr.bf16.mxu0 %v3752_v61 }
  0x82   : > { %2723 = vmatpush3.bf16.msra.mxu1 %v3793_v4 }
  0x83   : > { %2724 = vmatprep.subr.bf16.mxu1 %v4725_v12 }
  0x84   : > { %874 = vmatpush1.bf16.msra.mxu0 %v3765_v63 }
  0x85   : > { %875 = vmatprep.subr.bf16.mxu0 %v3771_v0 }
  0x86   : > { %2725 = vmatpush3.bf16.msra.mxu1 %v3803_v6 }
  0x87   : > { %2726 = vmatprep.subr.bf16.mxu1 %v4725_v12 }
  0x88   : > { %876 = vmatpush1.bf16.msra.mxu0 %v3784_v2 }
  0x89   : > { %974 = vmatprep.subr.bf16.mxu0 %v3485_v10 }
  0x8a   : > { %2727 = vmatpush3.bf16.msra.mxu1 %v3813_v7 }
  0x8b   : > { %894 = vmatmul.mubr.bf16.vlgmr.msra.gmra.mxu0 %v700_v5  ;;  %2732 = vmatprep.subr.bf16.mxu1 %v4725_v12 }
  0x8c   : > { %975 = vmatpush1.bf16.msra.mxu0 %v3490_v11  ;;  %1006 = vmatprep.mubr.bf16.mxu0 %v4721_v13 }
  0x8d   : > { %976 = vmatprep.subr.bf16.mxu0 %v3498_v14  ;;  %2729 = vmatmul.mubr.bf16.vlgmr.msra.gmra.mxu1 %v700_v5  ;;  %v437_v5 = vsub.s32 0, %v436_v60 }
  0x8e   : > { %2733 = vmatpush3.bf16.msra.mxu1 %v3531_v19  ;;  %2748 = vmatprep.mubr.msk.bf16.mxu1 %vm3342_vm0, %v4725_v12 }
  0x8f   : > { %2734 = vmatprep.subr.bf16.mxu1 %v4725_v12 }
  0x90   : > { %977 = vmatpush1.bf16.msra.mxu0 %v3506_v15 }
  0x91   : > { %978 = vmatprep.subr.bf16.mxu0 %v3513_v16 }
  0x92   : > { %2735 = vmatpush3.bf16.msra.mxu1 %v3549_v22 }
  0x93   : > { %2736 = vmatprep.subr.bf16.mxu1 %v4725_v12 }
  0x94   : > { %979 = vmatpush1.bf16.msra.mxu0 %v3520_v17 }
  0x95   : > { %980 = vmatprep.subr.bf16.mxu0 %v3526_v18 }
  0x96   : > { %2737 = vmatpush3.bf16.msra.mxu1 %v3568_v25 }
  0x97   : > { %2738 = vmatprep.subr.bf16.mxu1 %v4725_v12 }
  0x98   : > { %981 = vmatpush1.bf16.msra.mxu0 %v3537_v20 }
  0x99   : > { %982 = vmatprep.subr.bf16.mxu0 %v3543_v21 }
  0x9a   : > { %2739 = vmatpush3.bf16.msra.mxu1 %v3587_v28 }
  0x9b   : > { %2740 = vmatprep.subr.bf16.mxu1 %v4725_v12 }
  0x9c   : > { %983 = vmatpush1.bf16.msra.mxu0 %v3556_v23 }
  0x9d   : > { %984 = vmatprep.subr.bf16.mxu0 %v3562_v24 }
  0x9e   : > { %2741 = vmatpush3.bf16.msra.mxu1 %v3606_v31 }
  0x9f   : > { %2742 = vmatprep.subr.bf16.mxu1 %v4725_v12 }
  0xa0   : > { %985 = vmatpush1.bf16.msra.mxu0 %v3574_v26 }
  0xa1   : > { %986 = vmatprep.subr.bf16.mxu0 %v3580_v27 }
  0xa2   : > { %2743 = vmatpush3.bf16.msra.mxu1 %v3625_v34 }
  0xa3   : > { %2744 = vmatprep.subr.bf16.mxu1 %v4725_v12 }
  0xa4   : > { %987 = vmatpush1.bf16.msra.mxu0 %v3594_v29 }
  0xa5   : > { %988 = vmatprep.subr.bf16.mxu0 %v3599_v30 }
  0xa6   : > { %2745 = vmatpush3.bf16.msra.mxu1 %v3645_v38 }
  0xa7   : > { %2746 = vmatprep.subr.bf16.mxu1 %v4725_v12 }
  0xa8   : > { %989 = vmatpush1.bf16.msra.mxu0 %v3612_v32 }
  0xa9   : > { %1056 = vmatprep.subr.bf16.mxu0 %v3618_v33 }
  0xaa   : > { %2747 = vmatpush3.bf16.msra.mxu1 %v3666_v41 }
  0xab   : > { %2752 = vmatprep.subr.bf16.mxu1 %v4725_v12  ;;  %1007 = vmatmul.mubr.bf16.vlgmr.msra.gmra.mxu0 %v2521_v8 }
  0xac   : > { %1057 = vmatpush1.bf16.msra.mxu0 %v3633_v36  ;;  %1088 = vmatprep.mubr.bf16.mxu0 %v4721_v13 }
  0xad   : > { %2749 = vmatmul.mubr.bf16.vlgmr.msra.gmra.mxu1 %v2521_v8  ;;  %1058 = vmatprep.subr.bf16.mxu0 %v3638_v37  ;;  %v433_v8 = vld [vmem:[%s4716_s5] sm:$0x7] }
  0xae   : > { %2753 = vmatpush3.bf16.msra.mxu1 %v3691_v47  ;;  %2768 = vmatprep.mubr.msk.bf16.mxu1 %vm3342_vm0, %v4725_v12  ;;  %v3890_v13 = vrot.slane %v433_v8, %v437_v5 }
  0xaf   : > { %2754 = vmatprep.subr.bf16.mxu1 %v4725_v12 }
  0xb0   : > { %1059 = vmatpush1.bf16.msra.mxu0 %v3652_v39  ;;  %4779 = vst [vmem:[#allocation19_spill] sm:$0xff] %v3890_v13 }
  0xb1   : > { %1060 = vmatprep.subr.bf16.mxu0 %v3658_v40 }
  0xb2   : > { %2755 = vmatpush3.bf16.msra.mxu1 %v3714_v53 }
  0xb3   : > { %2756 = vmatprep.subr.bf16.mxu1 %v4725_v12 }
  0xb4   : > { %1061 = vmatpush1.bf16.msra.mxu0 %v3678_v45 }
  0xb5   : > { %1062 = vmatprep.subr.bf16.mxu0 %v3685_v46 }
  0xb6   : > { %2757 = vmatpush3.bf16.msra.mxu1 %v3737_v58 }
  0xb7   : > { %2758 = vmatprep.subr.bf16.mxu1 %v4725_v12 }
  0xb8   : > { %1063 = vmatpush1.bf16.msra.mxu0 %v3701_v50 }
  0xb9   : > { %1064 = vmatprep.subr.bf16.mxu0 %v3708_v52 }
  0xba   : > { %2759 = vmatpush3.bf16.msra.mxu1 %v3758_v62 }
  0xbb   : > { %2760 = vmatprep.subr.bf16.mxu1 %v4725_v12 }
  0xbc   : > { %1065 = vmatpush1.bf16.msra.mxu0 %v3724_v55 }
  0xbd   : > { %1066 = vmatprep.subr.bf16.mxu0 %v3731_v57 }
  0xbe   : > { %2761 = vmatpush3.bf16.msra.mxu1 %v3777_v1 }
  0xbf   : > { %2762 = vmatprep.subr.bf16.mxu1 %v4725_v12 }
  0xc0   : > { %1067 = vmatpush1.bf16.msra.mxu0 %v3745_v59 }
  0xc1   : > { %1068 = vmatprep.subr.bf16.mxu0 %v3752_v61 }
  0xc2   : > { %2763 = vmatpush3.bf16.msra.mxu1 %v3793_v4 }
  0xc3   : > { %2764 = vmatprep.subr.bf16.mxu1 %v4725_v12 }
  0xc4   : > { %1069 = vmatpush1.bf16.msra.mxu0 %v3765_v63 }
  0xc5   : > { %1070 = vmatprep.subr.bf16.mxu0 %v3771_v0 }
  0xc6   : > { %2765 = vmatpush3.bf16.msra.mxu1 %v3803_v6 }
  0xc7   : > { %2766 = vmatprep.subr.bf16.mxu1 %v4725_v12 }
  0xc8   : > { %1071 = vmatpush1.bf16.msra.mxu0 %v3784_v2 }
  0xc9   : > { %1170 = vmatprep.subr.bf16.mxu0 %v3485_v10 }
  0xca   : > { %2767 = vmatpush3.bf16.msra.mxu1 %v3813_v7  ;;  %v3893_v7 = vrot.slane %v433_v8, %v441_v44  ;;  %v445_v44 = vsub.s32 2, %v436_v60 }
  0xcb   : > { %2772 = vmatprep.subr.bf16.mxu1 %v4725_v12 }
 0x12b   : > { %v653_v9 = vpop.f32.mrf.mxu0 }
 0x12c   : > { %v654_v12 = vadd.f32 %v653_v9, %v3890_v13 }
 0x12d   : > { %v655_v35 = vpop.f32.mrf.mxu0  ;;  %v694_v48 = vpop.f32.mrf.mxu1 }
 0x12f   : > { %v657_v42 = vpop.f32.mrf.mxu0  ;;  %v2710_v49 = vpop.f32.mrf.mxu1 }
 0x131   : > { %v658_v43 = vpop.f32.mrf.mxu0  ;;  %v697_v51 = vpop.f32.mrf.mxu1 }
 0x133   : > { %v2711_v56 = vpop.f32.mrf.mxu1 }
 0x134   : > { %v656_v56 = vadd.f32 %v655_v35, %v3893_v7 }
 0x14b   : > { %v895_v10 = vpop.f32.mrf.mxu0 }
 0x14c   : > { %v942_v42 = vadd.f32 %v895_v10, %v654_v12  ;;  %v3899_v10 = vld [vmem:[%s4717_s6] ss:$0 sm:$0xff]  ;;  %v3901_v12 = vrot.slane %v433_v8, %v445_v44 }
 0x14d   : > { %v897_v43 = vpop.f32.mrf.mxu0  ;;  %v936_v0 = vpop.f32.mrf.mxu1 }
 0x14e   : > { %v2519_v49 = vmul.f32 -1.442695, %v942_v42  ;;  %v949_v2 = vadd.f32 %v897_v43, %v656_v56  ;;  %v956_v42 = vadd.f32 %v3899_v10, %v936_v0  ;;  %v969_v56 = vpop.permute.xlu0 %968 }
 0x14f   : > { %v899_v51 = vpop.f32.mrf.mxu0  ;;  %v2730_v63 = vpop.f32.mrf.mxu1  ;;  %vm970_vm5 = vcmp.eq.s32.totalorder %v969_v56, 1  ;;  %v4788_v56 = vld [vmem:[#allocation18_spill] sm:$0xff] }
 0x150   : > { %3139 = vpow2.f32 %v2519_v49  ;;  %v2520_v6 = vmul.f32 -1.442695, %v949_v2  ;;  %v695_v63 = vadd.f32 %v694_v48, %v3901_v12  ;;  %v4780_v48 = vmov 0.0  }
 0x151   : > { %v900_v54 = vpop.f32.mrf.mxu0  ;;  %v939_v5 = vpop.f32.mrf.mxu1 }
 0x152   : > { %3141 = vpow2.f32 %v2520_v6  ;;  %v4781_v54 = vmov 0  }
 0x153   : > { %v2731_v61 = vpop.f32.mrf.mxu1 }
 0x15d   : > { %v3140_v4 = vpop.eup %3139 }
 0x15e   : > { %v946_v9 = vadd.f32 1.0, %v3140_v4 }
 0x15f   : > { %v3142_v13 = vpop.eup %3141 }
 0x160   : > { %3143 = vrcp.f32 %v946_v9  ;;  %v953_v35 = vadd.f32 1.0, %v3142_v13 }
 0x162   : > { %3145 = vrcp.f32 %v953_v35 }
 0x16d   : > { %v3144_v2 = vpop.eup %3143  ;;  %v3944_v5 = vpop.f32.mrf.mxu1 }
 0x16e   : > { %v957_v61 = vmul.f32 %v3144_v2, %v956_v42 }
 0x16f   : > { %v3146_v4 = vpop.eup %3145  ;;  %v2750_v44 = vpop.f32.mrf.mxu1 }
 0x170   : > { %v958_v6 = vadd.f32 %v957_v61, %v695_v63  ;;  %v960_v60 = vsub.f32 1.0, %v3146_v4  ;;  %v962_v51 = vmul.f32 %v3146_v4, %v3786_v3  ;;  %v2524_v61 = vld [vmem:[%s3474_s13 + $0x8] sm:$0xf]  ;;  %v4783_v4 = vld [vmem:[#allocation12_spill] sm:$0xff]  ;;  %v1552_v44 = vstv %s1551_s25 }
 0x171   : > { %v1052_v42 = vpop.f32.mrf.mxu1 }
 0x172   : > { %3147 = vtanh.f32 %v958_v6  ;;  %v4782_v6 = vld [vmem:[#allocation16_spill] sm:$0xff] }
 0x173   : > { %v2751_v63 = vpop.f32.mrf.mxu1 }
 0x17f   : > { %v3148_v43 = vpop.eup %3147 }
 0x180   : > { %v961_v49 = vmul.f32 %v3148_v43, %v960_v60  ;;  %v4784_v60 = vld [vmem:[#allocation13_spill] sm:$0xff] }
 0x181   : > { %v4785_v43 = vld [vmem:[#allocation17_spill] sm:$0xff] }
 0x182   : > { %v963_v8 = vadd.f32 %v962_v51, %v961_v49  ;;  %v4786_v49 = vld [vmem:[#allocation14_spill] sm:$0xff]  ;;  %v4787_v51 = vld [vmem:[#allocation15_spill] sm:$0xff] }
 0x184   : > { %v3907_v13 = vsel %vm970_vm5, %v963_v8, %v3786_v3  ;;  %v3942_v3 = vpop.f32.mrf.mxu0  ;;  %v4789_v8 = vld [vmem:[#allocation8_spill] sm:$0xff] }
 0x185   : > { %v1055_v0 = vpack.c.bf16 %v3907_v13, %v3907_v13 }
 0x186   : > { %v3946_v9 = vpop.f32.mrf.mxu0 }
 0x187   : > { %1089 = vmatmul.mubr.bf16.vlgmr.msra.gmra.mxu0 %v1055_v0  ;;  %2769 = vmatmul.mubr.bf16.vlgmr.msra.gmra.mxu1 %v1055_v0  ;;  %v1356_v0 = vstv %s1355_s23 }
 0x188   : > { %1171 = vmatpush1.bf16.msra.mxu0 %v3490_v11  ;;  %2773 = vmatpush3.bf16.msra.mxu1 %v3531_v19  ;;  %v1012_v35 = vpop.f32.mrf.mxu0 }
 0x189   : > { %1172 = vmatprep.subr.bf16.mxu0 %v3498_v14  ;;  %2774 = vmatprep.subr.bf16.mxu1 %v4780_v48  ;;  %v4790_v35 = vld [vmem:[#allocation9_spill] sm:$0xff] }
 0x18a   : > { %1202 = vmatprep.mubr.bf16.mxu0 %v4781_v54  ;;  %2788 = vmatprep.mubr.msk.bf16.mxu1 %vm3342_vm0, %v4780_v48  ;;  %v1013_v2 = vpop.f32.mrf.mxu0  ;;  %vm1357_vm6 = vcmp.lt.s32.totalorder %v1356_v0, %v4790_v35  ;;  %vm1553_vm7 = vcmp.lt.s32.totalorder %v1552_v44, %v4790_v35  ;;  %v4791_v44 = vld [vmem:[#allocation19_spill] sm:$0xff] }
 0x18b   : > { %v1358_v42 = vsel %vm1357_vm6, 1, %v4781_v54  ;;  %v1944_v2 = vstv %s1943_s24  ;;  %v1554_v63 = vsel %vm1553_vm7, 1, %v4781_v54 }
 0x18c   : > { %1173 = vmatpush1.bf16.msra.mxu0 %v3506_v15  ;;  %2775 = vmatpush3.bf16.msra.mxu1 %v3549_v22  ;;  %vm1945_vm8 = vcmp.lt.s32.totalorder %v1944_v2, %v4790_v35 }
 0x18d   : > { %1174 = vmatprep.subr.bf16.mxu0 %v3513_v16  ;;  %2776 = vmatprep.subr.bf16.mxu1 %v4780_v48 }
 0x18e   : > { %1360 = vperm.xlu1 %3074, %v1358_v42  }
 0x190   : > { %1175 = vmatpush1.bf16.msra.mxu0 %v3520_v17  ;;  %2777 = vmatpush3.bf16.msra.mxu1 %v3568_v25 }
 0x191   : > { %1176 = vmatprep.subr.bf16.mxu0 %v3526_v18  ;;  %2778 = vmatprep.subr.bf16.mxu1 %v4780_v48 }
 0x192   : > { %1556 = vperm.xlu1 %3074, %v1554_v63   ;;  %v1011_v63 = vadd.f32 %v3946_v9, %v3893_v7 }
 0x194   : > { %1177 = vmatpush1.bf16.msra.mxu0 %v3537_v20  ;;  %2779 = vmatpush3.bf16.msra.mxu1 %v3587_v28 }
 0x195   : > { %1178 = vmatprep.subr.bf16.mxu0 %v3543_v21  ;;  %2780 = vmatprep.subr.bf16.mxu1 %v4780_v48 }
 0x198   : > { %1179 = vmatpush1.bf16.msra.mxu0 %v3556_v23  ;;  %2781 = vmatpush3.bf16.msra.mxu1 %v3606_v31 }
 0x199   : > { %1180 = vmatprep.subr.bf16.mxu0 %v3562_v24  ;;  %2782 = vmatprep.subr.bf16.mxu1 %v4780_v48 }
 0x19c   : > { %1181 = vmatpush1.bf16.msra.mxu0 %v3574_v26  ;;  %2783 = vmatpush3.bf16.msra.mxu1 %v3625_v34 }
 0x19d   : > { %1182 = vmatprep.subr.bf16.mxu0 %v3580_v27  ;;  %2784 = vmatprep.subr.bf16.mxu1 %v4780_v48 }
 0x1a0   : > { %1183 = vmatpush1.bf16.msra.mxu0 %v3594_v29  ;;  %2785 = vmatpush3.bf16.msra.mxu1 %v3645_v38 }
 0x1a1   : > { %1184 = vmatprep.subr.bf16.mxu0 %v3599_v30  ;;  %2786 = vmatprep.subr.bf16.mxu1 %v4780_v48 }
 0x1a4   : > { %1185 = vmatpush1.bf16.msra.mxu0 %v3612_v32  ;;  %2787 = vmatpush3.bf16.msra.mxu1 %v3666_v41 }
 0x1a5   : > { %1252 = vmatprep.subr.bf16.mxu0 %v3618_v33  ;;  %2792 = vmatprep.subr.bf16.mxu1 %v4780_v48 }
 0x1a7   : > { %1203 = vmatmul.mubr.bf16.vlgmr.msra.gmra.mxu0 %v2524_v61  ;;  %2789 = vmatmul.mubr.bf16.vlgmr.msra.gmra.mxu1 %v2524_v61  ;;  %v2336_v61 = vstv %s2335_s26 }
 0x1a8   : > { %1253 = vmatpush1.bf16.msra.mxu0 %v3633_v36  ;;  %2793 = vmatpush3.bf16.msra.mxu1 %v3691_v47  ;;  %vm2337_vm9 = vcmp.lt.s32.totalorder %v2336_v61, %v4790_v35 }
 0x1a9   : > { %1254 = vmatprep.subr.bf16.mxu0 %v3638_v37  ;;  %2794 = vmatprep.subr.bf16.mxu1 %v4780_v48  ;;  %v2338_v0 = vsel %vm2337_vm9, 1, %v4781_v54 }
 0x1aa   : > { %1284 = vmatprep.mubr.bf16.mxu0 %v4781_v54  ;;  %2808 = vmatprep.mubr.msk.bf16.mxu1 %vm3342_vm0, %v4780_v48 }
 0x1ac   : > { %1255 = vmatpush1.bf16.msra.mxu0 %v3652_v39  ;;  %2795 = vmatpush3.bf16.msra.mxu1 %v3714_v53 }
 0x1ad   : > { %1256 = vmatprep.subr.bf16.mxu0 %v3658_v40  ;;  %2796 = vmatprep.subr.bf16.mxu1 %v4780_v48 }
 0x1b0   : > { %1257 = vmatpush1.bf16.msra.mxu0 %v3678_v45  ;;  %2797 = vmatpush3.bf16.msra.mxu1 %v3737_v58 }
 0x1b1   : > { %1258 = vmatprep.subr.bf16.mxu0 %v3685_v46  ;;  %2798 = vmatprep.subr.bf16.mxu1 %v4780_v48 }
 0x1b4   : > { %1259 = vmatpush1.bf16.msra.mxu0 %v3701_v50  ;;  %2799 = vmatpush3.bf16.msra.mxu1 %v3758_v62 }
 0x1b5   : > { %1260 = vmatprep.subr.bf16.mxu0 %v3708_v52  ;;  %2800 = vmatprep.subr.bf16.mxu1 %v4780_v48 }
 0x1b8   : > { %1261 = vmatpush1.bf16.msra.mxu0 %v3724_v55  ;;  %2801 = vmatpush3.bf16.msra.mxu1 %v3777_v1 }
 0x1b9   : > { %1262 = vmatprep.subr.bf16.mxu0 %v3731_v57  ;;  %2802 = vmatprep.subr.bf16.mxu1 %v4780_v48 }
 0x1bc   : > { %1263 = vmatpush1.bf16.msra.mxu0 %v3745_v59  ;;  %2803 = vmatpush3.bf16.msra.mxu1 %v4782_v6 }
 0x1bd   : > { %1264 = vmatprep.subr.bf16.mxu0 %v4783_v4  ;;  %2804 = vmatprep.subr.bf16.mxu1 %v4780_v48 }
 0x1c0   : > { %1265 = vmatpush1.bf16.msra.mxu0 %v4784_v60  ;;  %2805 = vmatpush3.bf16.msra.mxu1 %v4785_v43 }
 0x1c1   : > { %1266 = vmatprep.subr.bf16.mxu0 %v4786_v49  ;;  %2806 = vmatprep.subr.bf16.mxu1 %v4780_v48 }
 0x1c4   : > { %1267 = vmatpush1.bf16.msra.mxu0 %v4787_v51  ;;  %2807 = vmatpush3.bf16.msra.mxu1 %v4788_v56  ;;  %v1009_v56 = vadd.f32 %v3942_v3, %v4791_v44 }
 0x1c5   : > { %1366 = vmatprep.subr.bf16.mxu0 %v4789_v8  ;;  %2812 = vmatprep.subr.bf16.mxu1 %v4780_v48  ;;  %v1946_v8 = vsel %vm1945_vm8, 1, %v4781_v54 }
 0x1c6   : > { %1948 = vperm.xlu1 %3074, %v1946_v8  }
 0x1ca   : > { %2340 = vperm.xlu1 %3074, %v2338_v0  }
 0x247   : > { %v1090_v51 = vpop.f32.mrf.mxu0  ;;  %v1131_v42 = vpop.f32.mrf.mxu1 }
 0x248   : > { %v1137_v49 = vadd.f32 %v1090_v51, %v1009_v56  ;;  %v1151_v51 = vadd.f32 %v3899_v10, %v1131_v42 }
 0x249   : > { %v1092_v43 = vpop.f32.mrf.mxu0  ;;  %v2770_v60 = vpop.f32.mrf.mxu1 }
 0x24a   : > { %v2522_v4 = vmul.f32 -1.442695, %v1137_v49  ;;  %v1144_v8 = vadd.f32 %v1092_v43, %v1011_v63  ;;  %v1165_v63 = vpop.permute.xlu0 %1164 }
 0x24b   : > { %v1094_v2 = vpop.f32.mrf.mxu0  ;;  %v1134_v6 = vpop.f32.mrf.mxu1  ;;  %vm1166_vm10 = vcmp.eq.s32.totalorder %v1165_v63, 1 }
 0x24c   : > { %3149 = vpow2.f32 %v2522_v4  ;;  %v2523_v59 = vmul.f32 -1.442695, %v1144_v8  ;;  %v1050_v6 = vadd.f32 %v3944_v5, %v3901_v12  ;;  %v1361_v63 = vpop.permute.xlu1 %1360 }
 0x24d   : > { %v1095_v35 = vpop.f32.mrf.mxu0  ;;  %v2771_v61 = vpop.f32.mrf.mxu1  ;;  %vm1362_vm11 = vcmp.eq.s32.totalorder %v1361_v63, 1  ;;  %v4277_v63 = vld [vmem:[%s4715_s4 + $0x90] ss:$12 sps:$4 sm:$0xff]  }
 0x24e   : > { %3151 = vpow2.f32 %v2523_v59 }
 0x259   : > { %v3150_v0 = vpop.eup %3149 }
 0x25a   : > { %v1141_v57 = vadd.f32 1.0, %v3150_v0 }
 0x25b   : > { %v3152_v3 = vpop.eup %3151 }
 0x25c   : > { %3153 = vrcp.f32 %v1141_v57  ;;  %v1148_v44 = vadd.f32 1.0, %v3152_v3 }
 0x25e   : > { %3155 = vrcp.f32 %v1148_v44 }
 0x269   : > { %v3154_v60 = vpop.eup %3153 }
 0x26a   : > { %v1152_v49 = vmul.f32 %v3154_v60, %v1151_v51 }
 0x26b   : > { %v3156_v4 = vpop.eup %3155 }
 0x26c   : > { %v1153_v9 = vadd.f32 %v1152_v49, %v1050_v6  ;;  %v1155_v56 = vsub.f32 1.0, %v3156_v4  ;;  %v1157_v59 = vmul.f32 %v3156_v4, %v3907_v13 }
 0x26e   : > { %3157 = vtanh.f32 %v1153_v9 }
 0x27b   : > { %v3158_v43 = vpop.eup %3157 }
 0x27c   : > { %v1156_v2 = vmul.f32 %v3158_v43, %v1155_v56 }
 0x27e   : > { %v1158_v57 = vadd.f32 %v1157_v59, %v1156_v2 }
 0x280   : > { %v4009_v35 = vsel %vm1166_vm10, %v1158_v57, %v3907_v13 }
 0x281   : > { %v1251_v42 = vpack.c.bf16 %v4009_v35, %v4009_v35 }
 0x283   : > { %1285 = vmatmul.mubr.bf16.vlgmr.msra.gmra.mxu0 %v1251_v42  ;;  %2809 = vmatmul.mubr.bf16.vlgmr.msra.gmra.mxu1 %v1251_v42 }
 0x284   : > { %1367 = vmatpush1.bf16.msra.mxu0 %v3490_v11  ;;  %2813 = vmatpush3.bf16.msra.mxu1 %v3531_v19  ;;  %v1204_v11 = vpop.f32.mrf.mxu0 }
 0x285   : > { %1368 = vmatprep.subr.bf16.mxu0 %v3498_v14  ;;  %2814 = vmatprep.subr.bf16.mxu1 %v4780_v48  ;;  %v4044_v14 = vpop.f32.mrf.mxu1 }
 0x286   : > { %1398 = vmatprep.mubr.bf16.mxu0 %v4781_v54  ;;  %2828 = vmatprep.mubr.msk.bf16.mxu1 %vm3342_vm0, %v4780_v48  ;;  %v1246_v9 = vadd.f32 %v4044_v14, %v3901_v12  ;;  %v4105_v14 = vld [vmem:[%s4714_s3 + $0xa8] ss:$12 sps:$4 sm:$0xff]  }
 0x288   : > { %1369 = vmatpush1.bf16.msra.mxu0 %v3506_v15  ;;  %2815 = vmatpush3.bf16.msra.mxu1 %v3549_v22  ;;  %v1206_v15 = vpop.f32.mrf.mxu0  ;;  %v4792_v22 = vld [vmem:[#allocation10_spill] sm:$0xff] }
 0x289   : > { %1370 = vmatprep.subr.bf16.mxu0 %v3513_v16  ;;  %2816 = vmatprep.subr.bf16.mxu1 %v4780_v48  ;;  %v2790_v16 = vpop.f32.mrf.mxu1  ;;  %v1207_v13 = vadd.f32 %v1206_v15, %v3893_v7 }
 0x28c   : > { %1371 = vmatpush1.bf16.msra.mxu0 %v3520_v17  ;;  %2817 = vmatpush3.bf16.msra.mxu1 %v3568_v25  ;;  %v1208_v17 = vpop.f32.mrf.mxu0  ;;  %v4795_v25 = vld [vmem:[#allocation12_spill] sm:$0xff] }
 0x28d   : > { %1372 = vmatprep.subr.bf16.mxu0 %v3526_v18  ;;  %2818 = vmatprep.subr.bf16.mxu1 %v4780_v48  ;;  %v1248_v18 = vpop.f32.mrf.mxu1  ;;  %v4111_v17 = vld [vmem:[%s4714_s3 + $0xb0] ss:$12 sps:$4 sm:$0xff]  }
 0x28e   : > { %v1209_v19 = vpop.f32.mrf.mxu0  ;;  %v4127_v18 = vld [vmem:[%s4714_s3 + $0x90] ss:$12 sps:$4 sm:$0xff]  }
 0x28f   : > { %v4133_v19 = vld [vmem:[%s4714_s3 + $0x98] ss:$12 sps:$4 sm:$0xff]  }
 0x290   : > { %1373 = vmatpush1.bf16.msra.mxu0 %v3537_v20  ;;  %2819 = vmatpush3.bf16.msra.mxu1 %v3587_v28  ;;  %v2791_v20 = vpop.f32.mrf.mxu1  ;;  %v4798_v28 = vld [vmem:[#allocation14_spill] sm:$0xff] }
 0x291   : > { %1374 = vmatprep.subr.bf16.mxu0 %v3543_v21  ;;  %2820 = vmatprep.subr.bf16.mxu1 %v4780_v48  ;;  %v2527_v21 = vld [vmem:[%s3474_s13 + $0xc] sm:$0xf]  ;;  %v4139_v20 = vld [vmem:[%s4714_s3 + $0x7c] ss:$12 sps:$4 sm:$0xff]  }
 0x294   : > { %1375 = vmatpush1.bf16.msra.mxu0 %v3556_v23  ;;  %2821 = vmatpush3.bf16.msra.mxu1 %v3606_v31  ;;  %v4793_v23 = vld [vmem:[#allocation11_spill] sm:$0xff]  ;;  %v4087_v31 = vld [vmem:[%s4714_s3 + $0xac] ss:$12 sps:$4 sm:$0xff]  }
 0x295   : > { %1376 = vmatprep.subr.bf16.mxu0 %v3562_v24  ;;  %2822 = vmatprep.subr.bf16.mxu1 %v4780_v48  ;;  %v4794_v24 = vld [vmem:[#allocation16_spill] sm:$0xff]  ;;  %4801 = vst [vmem:[#allocation8_spill] sm:$0xff] %v4087_v31 }
 0x298   : > { %1377 = vmatpush1.bf16.msra.mxu0 %v3574_v26  ;;  %2823 = vmatpush3.bf16.msra.mxu1 %v3625_v34  ;;  %v4796_v26 = vld [vmem:[#allocation13_spill] sm:$0xff] }
 0x299   : > { %1378 = vmatprep.subr.bf16.mxu0 %v3580_v27  ;;  %2824 = vmatprep.subr.bf16.mxu1 %v4780_v48  ;;  %v4797_v27 = vld [vmem:[#allocation17_spill] sm:$0xff] }
 0x29c   : > { %1379 = vmatpush1.bf16.msra.mxu0 %v3594_v29  ;;  %2825 = vmatpush3.bf16.msra.mxu1 %v3645_v38  ;;  %v4799_v29 = vld [vmem:[#allocation15_spill] sm:$0xff] }
 0x29d   : > { %1380 = vmatprep.subr.bf16.mxu0 %v3599_v30  ;;  %2826 = vmatprep.subr.bf16.mxu1 %v4780_v48  ;;  %v4800_v30 = vld [vmem:[#allocation18_spill] sm:$0xff] }
 0x2a0   : > { %1381 = vmatpush1.bf16.msra.mxu0 %v3612_v32  ;;  %2827 = vmatpush3.bf16.msra.mxu1 %v3666_v41  ;;  %v4802_v32 = vld [vmem:[#allocation19_spill] sm:$0xff] }
 0x2a1   : > { %1448 = vmatprep.subr.bf16.mxu0 %v3618_v33  ;;  %2832 = vmatprep.subr.bf16.mxu1 %v4780_v48  ;;  %v1205_v33 = vadd.f32 %v1204_v11, %v4802_v32 }
 0x2a3   : > { %1399 = vmatmul.mubr.bf16.vlgmr.msra.gmra.mxu0 %v2527_v21  ;;  %2829 = vmatmul.mubr.bf16.vlgmr.msra.gmra.mxu1 %v2527_v21  ;;  %v4146_v21 = vld [vmem:[%s4714_s3 + $0x78] ss:$12 sps:$4 sm:$0xff]  }
 0x2a4   : > { %1449 = vmatpush1.bf16.msra.mxu0 %v3633_v36  ;;  %2833 = vmatpush3.bf16.msra.mxu1 %v3691_v47 }
 0x2a5   : > { %1450 = vmatprep.subr.bf16.mxu0 %v3638_v37  ;;  %2834 = vmatprep.subr.bf16.mxu1 %v4780_v48 }
 0x2a6   : > { %1480 = vmatprep.mubr.bf16.mxu0 %v4781_v54  ;;  %2848 = vmatprep.mubr.msk.bf16.mxu1 %vm3342_vm0, %v4780_v48 }
 0x2a8   : > { %1451 = vmatpush1.bf16.msra.mxu0 %v3652_v39  ;;  %2835 = vmatpush3.bf16.msra.mxu1 %v3714_v53 }
 0x2a9   : > { %1452 = vmatprep.subr.bf16.mxu0 %v3658_v40  ;;  %2836 = vmatprep.subr.bf16.mxu1 %v4780_v48 }
 0x2ac   : > { %1453 = vmatpush1.bf16.msra.mxu0 %v3678_v45  ;;  %2837 = vmatpush3.bf16.msra.mxu1 %v3737_v58 }
 0x2ad   : > { %1454 = vmatprep.subr.bf16.mxu0 %v3685_v46  ;;  %2838 = vmatprep.subr.bf16.mxu1 %v4780_v48 }
 0x2b0   : > { %1455 = vmatpush1.bf16.msra.mxu0 %v3701_v50  ;;  %2839 = vmatpush3.bf16.msra.mxu1 %v3758_v62 }
 0x2b1   : > { %1456 = vmatprep.subr.bf16.mxu0 %v3708_v52  ;;  %2840 = vmatprep.subr.bf16.mxu1 %v4780_v48 }
 0x2b4   : > { %1457 = vmatpush1.bf16.msra.mxu0 %v3724_v55  ;;  %2841 = vmatpush3.bf16.msra.mxu1 %v3777_v1 }
 0x2b5   : > { %1458 = vmatprep.subr.bf16.mxu0 %v4792_v22  ;;  %2842 = vmatprep.subr.bf16.mxu1 %v4780_v48 }
 0x2b8   : > { %1459 = vmatpush1.bf16.msra.mxu0 %v4793_v23  ;;  %2843 = vmatpush3.bf16.msra.mxu1 %v4794_v24 }
 0x2b9   : > { %1460 = vmatprep.subr.bf16.mxu0 %v4795_v25  ;;  %2844 = vmatprep.subr.bf16.mxu1 %v4780_v48 }
 0x2bc   : > { %1461 = vmatpush1.bf16.msra.mxu0 %v4796_v26  ;;  %2845 = vmatpush3.bf16.msra.mxu1 %v4797_v27 }
 0x2bd   : > { %1462 = vmatprep.subr.bf16.mxu0 %v4798_v28  ;;  %2846 = vmatprep.subr.bf16.mxu1 %v4780_v48 }
 0x2c0   : > { %1463 = vmatpush1.bf16.msra.mxu0 %v4799_v29  ;;  %2847 = vmatpush3.bf16.msra.mxu1 %v4800_v30 }
 0x2c1   : > { %1562 = vmatprep.subr.bf16.mxu0 %v4087_v31  ;;  %2852 = vmatprep.subr.bf16.mxu1 %v4780_v48 }
 0x343   : > { %v1286_v34 = vpop.f32.mrf.mxu0  ;;  %v1327_v36 = vpop.f32.mrf.mxu1 }
 0x344   : > { %v1333_v37 = vadd.f32 %v1286_v34, %v1205_v33  ;;  %v1347_v6 = vadd.f32 %v3899_v10, %v1327_v36  ;;  %v4152_v33 = vld [vmem:[%s4714_s3 + $0x80] ss:$12 sps:$4 sm:$0xff]   ;;  %v4158_v34 = vld [vmem:[%s4714_s3 + $0x64] ss:$12 sps:$4 sm:$0xff]  }
 0x345   : > { %v1288_v38 = vpop.f32.mrf.mxu0  ;;  %v2810_v39 = vpop.f32.mrf.mxu1  ;;  %v4165_v36 = vld [vmem:[%s4714_s3 + $0x60] ss:$12 sps:$4 sm:$0xff]  }
 0x346   : > { %v2525_v40 = vmul.f32 -1.442695, %v1333_v37  ;;  %v1340_v61 = vadd.f32 %v1288_v38, %v1207_v13  ;;  %v4171_v37 = vld [vmem:[%s4714_s3 + $0x68] ss:$12 sps:$4 sm:$0xff]   ;;  %v4177_v38 = vld [vmem:[%s4714_s3 + $0x4c] ss:$12 sps:$4 sm:$0xff]  }
 0x347   : > { %v1290_v45 = vpop.f32.mrf.mxu0  ;;  %v1330_v46 = vpop.f32.mrf.mxu1  ;;  %v4184_v39 = vld [vmem:[%s4714_s3 + $0x48] ss:$12 sps:$4 sm:$0xff]   ;;  %v4209_v13 = vld [vmem:[%s4714_s3 + $0x38] ss:$12 sps:$4 sm:$0xff]  }
 0x348   : > { %3159 = vpow2.f32 %v2525_v40  ;;  %v2526_v8 = vmul.f32 -1.442695, %v1340_v61  ;;  %v4190_v40 = vld [vmem:[%s4714_s3 + $0x50] ss:$12 sps:$4 sm:$0xff]   ;;  %v4196_v45 = vld [vmem:[%s4714_s3 + $0x34] ss:$12 sps:$4 sm:$0xff]  }
 0x349   : > { %v1291_v5 = vpop.f32.mrf.mxu0  ;;  %v2811_v44 = vpop.f32.mrf.mxu1  ;;  %v4203_v46 = vld [vmem:[%s4714_s3 + $0x30] ss:$12 sps:$4 sm:$0xff]   ;;  %v4228_v61 = vld [vmem:[%s4714_s3 + $0x20] ss:$12 sps:$4 sm:$0xff]  }
 0x34a   : > { %3161 = vpow2.f32 %v2526_v8  ;;  %v4215_v5 = vld [vmem:[%s4714_s3 + $0x1c] ss:$12 sps:$4 sm:$0xff]   ;;  %v4222_v44 = vld [vmem:[%s4714_s3 + $0x18] ss:$12 sps:$4 sm:$0xff]  }
 0x34b   : > { %v4234_v8 = vld [vmem:[%s4714_s3 + $0x4] ss:$12 sps:$4 sm:$0xff]  }
 0x355   : > { %v3160_v0 = vpop.eup %3159 }
 0x356   : > { %v1337_v3 = vadd.f32 1.0, %v3160_v0 }
 0x357   : > { %v3162_v51 = vpop.eup %3161 }
 0x358   : > { %3163 = vrcp.f32 %v1337_v3  ;;  %v1344_v60 = vadd.f32 1.0, %v3162_v51 }
 0x35a   : > { %3165 = vrcp.f32 %v1344_v60 }
 0x363   : > { %v1400_v0 = vpop.f32.mrf.mxu0  ;;  %v4238_v3 = vpop.f32.mrf.mxu1 }
 0x365   : > { %v3164_v49 = vpop.eup %3163  ;;  %v4240_v51 = vpop.f32.mrf.mxu0 }
 0x366   : > { %v1348_v4 = vmul.f32 %v3164_v49, %v1347_v6  ;;  %v2830_v60 = vpop.f32.mrf.mxu1  ;;  %v4245_v6 = vld [vmem:[%s4714_s3] ss:$12 sps:$4 sm:$0xff]  }
 0x367   : > { %v3166_v43 = vpop.eup %3165  ;;  %v4252_v49 = vld [vmem:[%s4715_s4 + $0xac] ss:$12 sps:$4 sm:$0xff]  }
 0x368   : > { %v1349_v56 = vadd.f32 %v1348_v4, %v1246_v9  ;;  %v1351_v2 = vsub.f32 1.0, %v3166_v43  ;;  %v1353_v42 = vmul.f32 %v3166_v43, %v4009_v35  ;;  %v1404_v9 = vpop.f32.mrf.mxu0  ;;  %v1444_v4 = vpop.f32.mrf.mxu1 }
 0x369   : > { %v1442_v9 = vadd.f32 %v4238_v3, %v3901_v12 }
 0x36a   : > { %3167 = vtanh.f32 %v1349_v56  ;;  %v1405_v56 = vpop.f32.mrf.mxu0  ;;  %v2831_v43 = vpop.f32.mrf.mxu1 }
 0x377   : > { %v3168_v59 = vpop.eup %3167 }
 0x378   : > { %v1352_v57 = vmul.f32 %v3168_v59, %v1351_v2  ;;  %v2530_v2 = vld [vmem:[%s3474_s13 + $0x10] sm:$0xf]  ;;  %v4267_v59 = vld [vmem:[%s4715_s4 + $0x94] ss:$12 sps:$4 sm:$0xff]  }
 0x37a   : > { %v1354_v11 = vadd.f32 %v1353_v42, %v1352_v57  ;;  %v4291_v57 = vld [vmem:[%s4715_s4 + $0x78] ss:$12 sps:$4 sm:$0xff]  }
 0x37c   : > { %v4098_v15 = vsel %vm1362_vm11, %v1354_v11, %v4009_v35  ;;  %v4117_v35 = vld [vmem:[%s4714_s3 + $0x94] ss:$12 sps:$4 sm:$0xff]  }
 0x37d   : > { %v1447_v16 = vpack.c.bf16 %v4098_v15, %v4098_v15 }
 0x37f   : > { %1481 = vmatmul.mubr.bf16.vlgmr.msra.gmra.mxu0 %v1447_v16  ;;  %2849 = vmatmul.mubr.bf16.vlgmr.msra.gmra.mxu1 %v1447_v16 }
 0x380   : > { %1563 = vmatpush1.bf16.msra.mxu0 %v4105_v14  ;;  %2853 = vmatpush3.bf16.msra.mxu1 %v4111_v17 }
 0x381   : > { %1564 = vmatprep.subr.bf16.mxu0 %v4117_v35  ;;  %2854 = vmatprep.subr.bf16.mxu1 %v4780_v48 }
 0x382   : > { %1594 = vmatprep.mubr.bf16.mxu0 %v4781_v54  ;;  %2868 = vmatprep.mubr.msk.bf16.mxu1 %vm3342_vm0, %v4780_v48 }
 0x384   : > { %1565 = vmatpush1.bf16.msra.mxu0 %v4127_v18  ;;  %2855 = vmatpush3.bf16.msra.mxu1 %v4133_v19 }
 0x385   : > { %1566 = vmatprep.subr.bf16.mxu0 %v4139_v20  ;;  %2856 = vmatprep.subr.bf16.mxu1 %v4780_v48 }
 0x388   : > { %1567 = vmatpush1.bf16.msra.mxu0 %v4146_v21  ;;  %2857 = vmatpush3.bf16.msra.mxu1 %v4152_v33 }
 0x389   : > { %1568 = vmatprep.subr.bf16.mxu0 %v4158_v34  ;;  %2858 = vmatprep.subr.bf16.mxu1 %v4780_v48 }
 0x38c   : > { %1569 = vmatpush1.bf16.msra.mxu0 %v4165_v36  ;;  %2859 = vmatpush3.bf16.msra.mxu1 %v4171_v37 }
 0x38d   : > { %1570 = vmatprep.subr.bf16.mxu0 %v4177_v38  ;;  %2860 = vmatprep.subr.bf16.mxu1 %v4780_v48 }
 0x390   : > { %1571 = vmatpush1.bf16.msra.mxu0 %v4184_v39  ;;  %2861 = vmatpush3.bf16.msra.mxu1 %v4190_v40 }
 0x391   : > { %1572 = vmatprep.subr.bf16.mxu0 %v4196_v45  ;;  %2862 = vmatprep.subr.bf16.mxu1 %v4780_v48 }
 0x394   : > { %1573 = vmatpush1.bf16.msra.mxu0 %v4203_v46  ;;  %2863 = vmatpush3.bf16.msra.mxu1 %v4209_v13 }
 0x395   : > { %1574 = vmatprep.subr.bf16.mxu0 %v4215_v5  ;;  %2864 = vmatprep.subr.bf16.mxu1 %v4780_v48 }
 0x398   : > { %1575 = vmatpush1.bf16.msra.mxu0 %v4222_v44  ;;  %2865 = vmatpush3.bf16.msra.mxu1 %v4228_v61 }
 0x399   : > { %1576 = vmatprep.subr.bf16.mxu0 %v4234_v8  ;;  %2866 = vmatprep.subr.bf16.mxu1 %v4780_v48 }
 0x39c   : > { %1577 = vmatpush1.bf16.msra.mxu0 %v4245_v6  ;;  %2867 = vmatpush3.bf16.msra.mxu1 %v3666_v41  ;;  %v4260_v41 = vld [vmem:[%s4715_s4 + $0xa8] ss:$12 sps:$4 sm:$0xff]  }
 0x39d   : > { %1644 = vmatprep.subr.bf16.mxu0 %v4252_v49  ;;  %2872 = vmatprep.subr.bf16.mxu1 %v4780_v48 }
 0x39f   : > { %1595 = vmatmul.mubr.bf16.vlgmr.msra.gmra.mxu0 %v2530_v2  ;;  %2869 = vmatmul.mubr.bf16.vlgmr.msra.gmra.mxu1 %v2530_v2 }
 0x3a0   : > { %1645 = vmatpush1.bf16.msra.mxu0 %v4260_v41  ;;  %2873 = vmatpush3.bf16.msra.mxu1 %v3691_v47  ;;  %v4284_v47 = vld [vmem:[%s4715_s4 + $0x7c] ss:$12 sps:$4 sm:$0xff]  }
 0x3a1   : > { %1646 = vmatprep.subr.bf16.mxu0 %v4267_v59  ;;  %2874 = vmatprep.subr.bf16.mxu1 %v4780_v48 }
 0x3a2   : > { %1676 = vmatprep.mubr.bf16.mxu0 %v4781_v54  ;;  %2888 = vmatprep.mubr.msk.bf16.mxu1 %vm3342_vm0, %v4780_v48 }
 0x3a4   : > { %1647 = vmatpush1.bf16.msra.mxu0 %v4277_v63  ;;  %2875 = vmatpush3.bf16.msra.mxu1 %v3714_v53  ;;  %v4298_v53 = vld [vmem:[%s4715_s4 + $0x64] ss:$12 sps:$4 sm:$0xff]  }
 0x3a5   : > { %1648 = vmatprep.subr.bf16.mxu0 %v4284_v47  ;;  %2876 = vmatprep.subr.bf16.mxu1 %v4780_v48 }
 0x3a8   : > { %1649 = vmatpush1.bf16.msra.mxu0 %v4291_v57  ;;  %2877 = vmatpush3.bf16.msra.mxu1 %v3737_v58 }
 0x3a9   : > { %1650 = vmatprep.subr.bf16.mxu0 %v4298_v53  ;;  %2878 = vmatprep.subr.bf16.mxu1 %v4780_v48 }
 0x3ac   : > { %1651 = vmatpush1.bf16.msra.mxu0 %v3701_v50  ;;  %2879 = vmatpush3.bf16.msra.mxu1 %v3758_v62  ;;  %v1401_v50 = vadd.f32 %v1400_v0, %v4802_v32 }
 0x3ad   : > { %1652 = vmatprep.subr.bf16.mxu0 %v3708_v52  ;;  %2880 = vmatprep.subr.bf16.mxu1 %v4780_v48 }
 0x3b0   : > { %1653 = vmatpush1.bf16.msra.mxu0 %v3724_v55  ;;  %2881 = vmatpush3.bf16.msra.mxu1 %v3777_v1 }
 0x3b1   : > { %1654 = vmatprep.subr.bf16.mxu0 %v4792_v22  ;;  %2882 = vmatprep.subr.bf16.mxu1 %v4780_v48 }
 0x3b4   : > { %1655 = vmatpush1.bf16.msra.mxu0 %v4793_v23  ;;  %2883 = vmatpush3.bf16.msra.mxu1 %v4794_v24 }
 0x3b5   : > { %1656 = vmatprep.subr.bf16.mxu0 %v4795_v25  ;;  %2884 = vmatprep.subr.bf16.mxu1 %v4780_v48  ;;  %v1403_v25 = vadd.f32 %v4240_v51, %v3893_v7 }
 0x3b8   : > { %1657 = vmatpush1.bf16.msra.mxu0 %v4796_v26  ;;  %2885 = vmatpush3.bf16.msra.mxu1 %v4797_v27 }
 0x3b9   : > { %1658 = vmatprep.subr.bf16.mxu0 %v4798_v28  ;;  %2886 = vmatprep.subr.bf16.mxu1 %v4780_v48 }
 0x3bc   : > { %1659 = vmatpush1.bf16.msra.mxu0 %v4799_v29  ;;  %2887 = vmatpush3.bf16.msra.mxu1 %v4800_v30 }
 0x3bd   : > { %1758 = vmatprep.subr.bf16.mxu0 %v4087_v31  ;;  %2892 = vmatprep.subr.bf16.mxu1 %v4780_v48 }
 0x43f   : > { %v1482_v52 = vpop.f32.mrf.mxu0  ;;  %v1523_v55 = vpop.f32.mrf.mxu1 }
 0x440   : > { %v1529_v58 = vadd.f32 %v1482_v52, %v1401_v50  ;;  %v1543_v0 = vadd.f32 %v3899_v10, %v1523_v55 }
 0x441   : > { %v1484_v62 = vpop.f32.mrf.mxu0  ;;  %v2850_v1 = vpop.f32.mrf.mxu1 }
 0x442   : > { %v2528_v22 = vmul.f32 -1.442695, %v1529_v58  ;;  %v1536_v28 = vadd.f32 %v1484_v62, %v1403_v25  ;;  %v1557_v58 = vpop.permute.xlu1 %1556 }
 0x443   : > { %v1486_v23 = vpop.f32.mrf.mxu0  ;;  %v1526_v24 = vpop.f32.mrf.mxu1  ;;  %vm1558_vm12 = vcmp.eq.s32.totalorder %v1557_v58, 1  ;;  %v4483_v58 = vld [vmem:[%s4715_s4 + $0x4] ss:$12 sps:$4 sm:$0xff]  }
 0x444   : > { %3169 = vpow2.f32 %v2528_v22  ;;  %v2529_v29 = vmul.f32 -1.442695, %v1536_v28  ;;  %v4375_v24 = vld [vmem:[%s4714_s3 + $0x8] ss:$12 sps:$4 sm:$0xff]   ;;  %4809 = vst [vmem:[#allocation17_spill] sm:$0xff] %v4483_v58 }
 0x445   : > { %v1487_v26 = vpop.f32.mrf.mxu0  ;;  %v2851_v27 = vpop.f32.mrf.mxu1 }
 0x446   : > { %3171 = vpow2.f32 %v2529_v29  ;;  %v2533_v29 = vld [vmem:[%s3474_s13 + $0x14] sm:$0xf] }
 0x451   : > { %v3170_v30 = vpop.eup %3169 }
 0x452   : > { %v1533_v42 = vadd.f32 1.0, %v3170_v30  ;;  %v4385_v30 = vld [vmem:[%s4715_s4 + $0xb0] ss:$12 sps:$4 sm:$0xff]  }
 0x453   : > { %v3172_v11 = vpop.eup %3171 }
 0x454   : > { %3173 = vrcp.f32 %v1533_v42  ;;  %v1540_v16 = vadd.f32 1.0, %v3172_v11  ;;  %v4397_v42 = vld [vmem:[%s4715_s4 + $0x98] ss:$12 sps:$4 sm:$0xff]   ;;  %v4406_v11 = vld [vmem:[%s4715_s4 + $0x80] ss:$12 sps:$4 sm:$0xff]  }
 0x456   : > { %3175 = vrcp.f32 %v1540_v16  ;;  %v4414_v16 = vld [vmem:[%s4715_s4 + $0x60] ss:$12 sps:$4 sm:$0xff]  }
 0x45f   : > { %v4367_v3 = vpop.f32.mrf.mxu1 }
 0x461   : > { %v3174_v60 = vpop.eup %3173  ;;  %v2870_v23 = vpop.f32.mrf.mxu1 }
 0x462   : > { %v1544_v4 = vmul.f32 %v3174_v60, %v1543_v0  ;;  %v4420_v0 = vld [vmem:[%s4715_s4 + $0x68] ss:$12 sps:$4 sm:$0xff]   ;;  %v4426_v60 = vld [vmem:[%s4715_s4 + $0x4c] ss:$12 sps:$4 sm:$0xff]  }
 0x463   : > { %v3176_v56 = vpop.eup %3175  ;;  %v1640_v26 = vpop.f32.mrf.mxu1 }
 0x464   : > { %v1545_v51 = vadd.f32 %v1544_v4, %v1442_v9  ;;  %v1547_v43 = vsub.f32 1.0, %v3176_v56  ;;  %v1549_v52 = vmul.f32 %v3176_v56, %v4098_v15  ;;  %v4433_v9 = vld [vmem:[%s4715_s4 + $0x48] ss:$12 sps:$4 sm:$0xff]   ;;  %v4439_v4 = vld [vmem:[%s4715_s4 + $0x50] ss:$12 sps:$4 sm:$0xff]  }
 0x465   : > { %v2871_v28 = vpop.f32.mrf.mxu1  ;;  %v4452_v56 = vld [vmem:[%s4715_s4 + $0x30] ss:$12 sps:$4 sm:$0xff]  }
 0x466   : > { %3177 = vtanh.f32 %v1545_v51  ;;  %v4445_v51 = vld [vmem:[%s4715_s4 + $0x34] ss:$12 sps:$4 sm:$0xff]   ;;  %4804 = vst [vmem:[#allocation10_spill] sm:$0xff] %v4452_v56 }
 0x467   : > { %4803 = vst [vmem:[#allocation9_spill] sm:$0xff] %v4445_v51 }
 0x473   : > { %v3178_v2 = vpop.eup %3177 }
 0x474   : > { %v1548_v50 = vmul.f32 %v3178_v2, %v1547_v43  ;;  %v4458_v43 = vld [vmem:[%s4715_s4 + $0x38] ss:$12 sps:$4 sm:$0xff]   ;;  %v4464_v2 = vld [vmem:[%s4715_s4 + $0x1c] ss:$12 sps:$4 sm:$0xff]  }
 0x475   : > { %4805 = vst [vmem:[#allocation11_spill] sm:$0xff] %v4458_v43  ;;  %4806 = vst [vmem:[#allocation16_spill] sm:$0xff] %v4464_v2 }
 0x476   : > { %v1550_v62 = vadd.f32 %v1549_v52, %v1548_v50  ;;  %v4471_v50 = vld [vmem:[%s4715_s4 + $0x18] ss:$12 sps:$4 sm:$0xff]   ;;  %v4477_v52 = vld [vmem:[%s4715_s4 + $0x20] ss:$12 sps:$4 sm:$0xff]  }
 0x477   : > { %4807 = vst [vmem:[#allocation12_spill] sm:$0xff] %v4471_v50  ;;  %4808 = vst [vmem:[#allocation13_spill] sm:$0xff] %v4477_v52 }
 0x478   : > { %v4330_v1 = vsel %vm1558_vm12, %v1550_v62, %v4098_v15  ;;  %v4365_v15 = vpop.f32.mrf.mxu0  ;;  %v4490_v62 = vld [vmem:[%s4715_s4] ss:$12 sps:$4 sm:$0xff]  }
 0x479   : > { %v1643_v55 = vpack.c.bf16 %v4330_v1, %v4330_v1  ;;  %4810 = vst [vmem:[#allocation14_spill] sm:$0xff] %v4490_v62  ;;  %v1597_v23 = vadd.f32 %v4365_v15, %v4802_v32 }
 0x47a   : > { %v4369_v22 = vpop.f32.mrf.mxu0 }
 0x47b   : > { %1677 = vmatmul.mubr.bf16.vlgmr.msra.gmra.mxu0 %v1643_v55  ;;  %2889 = vmatmul.mubr.bf16.vlgmr.msra.gmra.mxu1 %v1643_v55  ;;  %v4496_v55 = vld [vmem:[%s4715_s4 + $0x8] ss:$12 sps:$4 sm:$0xff]  }
 0x47c   : > { %1759 = vmatpush1.bf16.msra.mxu0 %v4105_v14  ;;  %2893 = vmatpush3.bf16.msra.mxu1 %v4111_v17  ;;  %v1600_v25 = vpop.f32.mrf.mxu0  ;;  %4811 = vst [vmem:[#allocation15_spill] sm:$0xff] %v4496_v55 }
 0x47d   : > { %1760 = vmatprep.subr.bf16.mxu0 %v4117_v35  ;;  %2894 = vmatprep.subr.bf16.mxu1 %v4780_v48 }
 0x47e   : > { %1790 = vmatprep.mubr.bf16.mxu0 %v4781_v54  ;;  %2908 = vmatprep.mubr.msk.bf16.mxu1 %vm3342_vm0, %v4780_v48  ;;  %v1601_v27 = vpop.f32.mrf.mxu0 }
 0x480   : > { %1761 = vmatpush1.bf16.msra.mxu0 %v4127_v18  ;;  %2895 = vmatpush3.bf16.msra.mxu1 %v4133_v19 }
 0x481   : > { %1762 = vmatprep.subr.bf16.mxu0 %v4139_v20  ;;  %2896 = vmatprep.subr.bf16.mxu1 %v4780_v48 }
 0x484   : > { %1763 = vmatpush1.bf16.msra.mxu0 %v4146_v21  ;;  %2897 = vmatpush3.bf16.msra.mxu1 %v4152_v33 }
 0x485   : > { %1764 = vmatprep.subr.bf16.mxu0 %v4158_v34  ;;  %2898 = vmatprep.subr.bf16.mxu1 %v4780_v48 }
 0x488   : > { %1765 = vmatpush1.bf16.msra.mxu0 %v4165_v36  ;;  %2899 = vmatpush3.bf16.msra.mxu1 %v4171_v37 }
 0x489   : > { %1766 = vmatprep.subr.bf16.mxu0 %v4177_v38  ;;  %2900 = vmatprep.subr.bf16.mxu1 %v4780_v48 }
 0x48c   : > { %1767 = vmatpush1.bf16.msra.mxu0 %v4184_v39  ;;  %2901 = vmatpush3.bf16.msra.mxu1 %v4190_v40 }
 0x48d   : > { %1768 = vmatprep.subr.bf16.mxu0 %v4196_v45  ;;  %2902 = vmatprep.subr.bf16.mxu1 %v4780_v48 }
 0x490   : > { %1769 = vmatpush1.bf16.msra.mxu0 %v4203_v46  ;;  %2903 = vmatpush3.bf16.msra.mxu1 %v4209_v13 }
 0x491   : > { %1770 = vmatprep.subr.bf16.mxu0 %v4215_v5  ;;  %2904 = vmatprep.subr.bf16.mxu1 %v4780_v48 }
 0x494   : > { %1771 = vmatpush1.bf16.msra.mxu0 %v4222_v44  ;;  %2905 = vmatpush3.bf16.msra.mxu1 %v4228_v61 }
 0x495   : > { %1772 = vmatprep.subr.bf16.mxu0 %v4234_v8  ;;  %2906 = vmatprep.subr.bf16.mxu1 %v4780_v48 }
 0x498   : > { %1773 = vmatpush1.bf16.msra.mxu0 %v4245_v6  ;;  %2907 = vmatpush3.bf16.msra.mxu1 %v4375_v24 }
 0x499   : > { %1840 = vmatprep.subr.bf16.mxu0 %v4252_v49  ;;  %2912 = vmatprep.subr.bf16.mxu1 %v4780_v48 }
 0x49b   : > { %1791 = vmatmul.mubr.bf16.vlgmr.msra.gmra.mxu0 %v2533_v29  ;;  %2909 = vmatmul.mubr.bf16.vlgmr.msra.gmra.mxu1 %v2533_v29 }
 0x49c   : > { %1841 = vmatpush1.bf16.msra.mxu0 %v4260_v41  ;;  %2913 = vmatpush3.bf16.msra.mxu1 %v4385_v30 }
 0x49d   : > { %1842 = vmatprep.subr.bf16.mxu0 %v4267_v59  ;;  %2914 = vmatprep.subr.bf16.mxu1 %v4780_v48 }
 0x49e   : > { %1872 = vmatprep.mubr.bf16.mxu0 %v4781_v54  ;;  %2928 = vmatprep.mubr.msk.bf16.mxu1 %vm3342_vm0, %v4780_v48 }
 0x4a0   : > { %1843 = vmatpush1.bf16.msra.mxu0 %v4277_v63  ;;  %2915 = vmatpush3.bf16.msra.mxu1 %v4397_v42 }
 0x4a1   : > { %1844 = vmatprep.subr.bf16.mxu0 %v4284_v47  ;;  %2916 = vmatprep.subr.bf16.mxu1 %v4780_v48 }
 0x4a4   : > { %1845 = vmatpush1.bf16.msra.mxu0 %v4291_v57  ;;  %2917 = vmatpush3.bf16.msra.mxu1 %v4406_v11 }
 0x4a5   : > { %1846 = vmatprep.subr.bf16.mxu0 %v4298_v53  ;;  %2918 = vmatprep.subr.bf16.mxu1 %v4780_v48 }
 0x4a8   : > { %1847 = vmatpush1.bf16.msra.mxu0 %v4414_v16  ;;  %2919 = vmatpush3.bf16.msra.mxu1 %v4420_v0 }
 0x4a9   : > { %1848 = vmatprep.subr.bf16.mxu0 %v4426_v60  ;;  %2920 = vmatprep.subr.bf16.mxu1 %v4780_v48 }
 0x4ac   : > { %1849 = vmatpush1.bf16.msra.mxu0 %v4433_v9  ;;  %2921 = vmatpush3.bf16.msra.mxu1 %v4439_v4 }
 0x4ad   : > { %1850 = vmatprep.subr.bf16.mxu0 %v4445_v51  ;;  %2922 = vmatprep.subr.bf16.mxu1 %v4780_v48 }
 0x4b0   : > { %1851 = vmatpush1.bf16.msra.mxu0 %v4452_v56  ;;  %2923 = vmatpush3.bf16.msra.mxu1 %v4458_v43 }
 0x4b1   : > { %1852 = vmatprep.subr.bf16.mxu0 %v4464_v2  ;;  %2924 = vmatprep.subr.bf16.mxu1 %v4780_v48 }
 0x4b4   : > { %1853 = vmatpush1.bf16.msra.mxu0 %v4471_v50  ;;  %2925 = vmatpush3.bf16.msra.mxu1 %v4477_v52  ;;  %v1599_v50 = vadd.f32 %v4369_v22, %v3893_v7 }
 0x4b5   : > { %1854 = vmatprep.subr.bf16.mxu0 %v4483_v58  ;;  %2926 = vmatprep.subr.bf16.mxu1 %v4780_v48 }
 0x4b8   : > { %1855 = vmatpush1.bf16.msra.mxu0 %v4490_v62  ;;  %2927 = vmatpush3.bf16.msra.mxu1 %v4496_v55 }
 0x4b9   : > { %1954 = vmatprep.subr.bf16.mxu0 %v4087_v31  ;;  %2932 = vmatprep.subr.bf16.mxu1 %v4780_v48 }
 0x53b   : > { %v1678_v25 = vpop.f32.mrf.mxu0  ;;  %v1719_v26 = vpop.f32.mrf.mxu1 }
 0x53c   : > { %v1725_v27 = vadd.f32 %v1678_v25, %v1597_v23  ;;  %v1739_v23 = vadd.f32 %v3899_v10, %v1719_v26 }
 0x53d   : > { %v1680_v28 = vpop.f32.mrf.mxu0  ;;  %v2890_v29 = vpop.f32.mrf.mxu1 }
 0x53e   : > { %v2531_v62 = vmul.f32 -1.442695, %v1725_v27  ;;  %v1732_v31 = vadd.f32 %v1680_v28, %v1599_v50 }
 0x53f   : > { %v1682_v58 = vpop.f32.mrf.mxu0  ;;  %v1722_v52 = vpop.f32.mrf.mxu1 }
 0x540   : > { %3179 = vpow2.f32 %v2531_v62  ;;  %v2532_v43 = vmul.f32 -1.442695, %v1732_v31  ;;  %v1638_v52 = vadd.f32 %v4367_v3, %v3901_v12 }
 0x541   : > { %v1683_v55 = vpop.f32.mrf.mxu0  ;;  %v2891_v2 = vpop.f32.mrf.mxu1 }
 0x542   : > { %3181 = vpow2.f32 %v2532_v43 }
 0x54d   : > { %v3180_v56 = vpop.eup %3179 }
 0x54e   : > { %v1729_v51 = vadd.f32 1.0, %v3180_v56  ;;  %v1753_v56 = vpop.permute.xlu0 %1752 }
 0x54f   : > { %v3182_v15 = vpop.eup %3181  ;;  %vm1754_vm13 = vcmp.eq.s32.totalorder %v1753_v56, 1  ;;  %v4821_v56 = vld [vmem:[#allocation8_spill] sm:$0xff] }
 0x550   : > { %3183 = vrcp.f32 %v1729_v51  ;;  %v1736_v32 = vadd.f32 1.0, %v3182_v15 }
 0x552   : > { %3185 = vrcp.f32 %v1736_v32 }
 0x55b   : > { %v1792_v32 = vpop.f32.mrf.mxu0 }
 0x55d   : > { %v3184_v25 = vpop.eup %3183  ;;  %v1794_v3 = vpop.f32.mrf.mxu0 }
 0x55e   : > { %v1740_v58 = vmul.f32 %v3184_v25, %v1739_v23  ;;  %v2536_v23 = vld [vmem:[%s3474_s13 + $0x18] sm:$0xf]  ;;  %v4812_v25 = vld [vmem:[#allocation9_spill] sm:$0xff] }
 0x55f   : > { %v3186_v62 = vpop.eup %3185  ;;  %v1796_v27 = vpop.f32.mrf.mxu0 }
 0x560   : > { %v1741_v22 = vadd.f32 %v1740_v58, %v1638_v52  ;;  %v1743_v2 = vsub.f32 1.0, %v3186_v62  ;;  %v1745_v43 = vmul.f32 %v3186_v62, %v4330_v1  ;;  %v4813_v52 = vld [vmem:[#allocation10_spill] sm:$0xff]  ;;  %v4814_v58 = vld [vmem:[#allocation11_spill] sm:$0xff]  ;;  %v4816_v62 = vld [vmem:[#allocation12_spill] sm:$0xff] }
 0x561   : > { %v1797_v29 = vpop.f32.mrf.mxu0 }
 0x562   : > { %3187 = vtanh.f32 %v1741_v22  ;;  %v4815_v22 = vld [vmem:[#allocation16_spill] sm:$0xff] }
 0x56f   : > { %v3188_v50 = vpop.eup %3187 }
 0x570   : > { %v1744_v31 = vmul.f32 %v3188_v50, %v1743_v2  ;;  %v4817_v2 = vld [vmem:[#allocation13_spill] sm:$0xff] }
 0x571   : > { %v4818_v50 = vld [vmem:[#allocation17_spill] sm:$0xff] }
 0x572   : > { %v1746_v51 = vadd.f32 %v1745_v43, %v1744_v31  ;;  %v4819_v31 = vld [vmem:[#allocation14_spill] sm:$0xff]  ;;  %v4820_v43 = vld [vmem:[#allocation15_spill] sm:$0xff] }
 0x574   : > { %v4510_v55 = vsel %vm1754_vm13, %v1746_v51, %v4330_v1  ;;  %v4545_v1 = vpop.f32.mrf.mxu1  ;;  %v4822_v51 = vld [vmem:[#allocation19_spill] sm:$0xff] }
 0x575   : > { %v1839_v10 = vpack.c.bf16 %v4510_v55, %v4510_v55 }
 0x576   : > { %v2910_v26 = vpop.f32.mrf.mxu1 }
 0x577   : > { %1873 = vmatmul.mubr.bf16.vlgmr.msra.gmra.mxu0 %v1839_v10  ;;  %2929 = vmatmul.mubr.bf16.vlgmr.msra.gmra.mxu1 %v1839_v10  ;;  %v1793_v10 = vadd.f32 %v1792_v32, %v4822_v51 }
 0x578   : > { %1955 = vmatpush1.bf16.msra.mxu0 %v4105_v14  ;;  %2933 = vmatpush3.bf16.msra.mxu1 %v4111_v17  ;;  %v1836_v28 = vpop.f32.mrf.mxu1 }
 0x579   : > { %1956 = vmatprep.subr.bf16.mxu0 %v4117_v35  ;;  %2934 = vmatprep.subr.bf16.mxu1 %v4780_v48 }
 0x57a   : > { %1986 = vmatprep.mubr.bf16.mxu0 %v4781_v54  ;;  %2948 = vmatprep.mubr.msk.bf16.mxu1 %vm3342_vm0, %v4780_v48  ;;  %v2911_v15 = vpop.f32.mrf.mxu1 }
 0x57c   : > { %1957 = vmatpush1.bf16.msra.mxu0 %v4127_v18  ;;  %2935 = vmatpush3.bf16.msra.mxu1 %v4133_v19 }
 0x57d   : > { %1958 = vmatprep.subr.bf16.mxu0 %v4139_v20  ;;  %2936 = vmatprep.subr.bf16.mxu1 %v4780_v48 }
 0x580   : > { %1959 = vmatpush1.bf16.msra.mxu0 %v4146_v21  ;;  %2937 = vmatpush3.bf16.msra.mxu1 %v4152_v33 }
 0x581   : > { %1960 = vmatprep.subr.bf16.mxu0 %v4158_v34  ;;  %2938 = vmatprep.subr.bf16.mxu1 %v4780_v48 }
 0x584   : > { %1961 = vmatpush1.bf16.msra.mxu0 %v4165_v36  ;;  %2939 = vmatpush3.bf16.msra.mxu1 %v4171_v37 }
 0x585   : > { %1962 = vmatprep.subr.bf16.mxu0 %v4177_v38  ;;  %2940 = vmatprep.subr.bf16.mxu1 %v4780_v48 }
 0x588   : > { %1963 = vmatpush1.bf16.msra.mxu0 %v4184_v39  ;;  %2941 = vmatpush3.bf16.msra.mxu1 %v4190_v40 }
 0x589   : > { %1964 = vmatprep.subr.bf16.mxu0 %v4196_v45  ;;  %2942 = vmatprep.subr.bf16.mxu1 %v4780_v48 }
 0x58c   : > { %1965 = vmatpush1.bf16.msra.mxu0 %v4203_v46  ;;  %2943 = vmatpush3.bf16.msra.mxu1 %v4209_v13 }
 0x58d   : > { %1966 = vmatprep.subr.bf16.mxu0 %v4215_v5  ;;  %2944 = vmatprep.subr.bf16.mxu1 %v4780_v48 }
 0x590   : > { %1967 = vmatpush1.bf16.msra.mxu0 %v4222_v44  ;;  %2945 = vmatpush3.bf16.msra.mxu1 %v4228_v61 }
 0x591   : > { %1968 = vmatprep.subr.bf16.mxu0 %v4234_v8  ;;  %2946 = vmatprep.subr.bf16.mxu1 %v4780_v48 }
 0x594   : > { %1969 = vmatpush1.bf16.msra.mxu0 %v4245_v6  ;;  %2947 = vmatpush3.bf16.msra.mxu1 %v4375_v24 }
 0x595   : > { %2036 = vmatprep.subr.bf16.mxu0 %v4252_v49  ;;  %2952 = vmatprep.subr.bf16.mxu1 %v4780_v48 }
 0x597   : > { %1987 = vmatmul.mubr.bf16.vlgmr.msra.gmra.mxu0 %v2536_v23  ;;  %2949 = vmatmul.mubr.bf16.vlgmr.msra.gmra.mxu1 %v2536_v23 }
 0x598   : > { %2037 = vmatpush1.bf16.msra.mxu0 %v4260_v41  ;;  %2953 = vmatpush3.bf16.msra.mxu1 %v4385_v30 }
 0x599   : > { %2038 = vmatprep.subr.bf16.mxu0 %v4267_v59  ;;  %2954 = vmatprep.subr.bf16.mxu1 %v4780_v48 }
 0x59a   : > { %2068 = vmatprep.mubr.bf16.mxu0 %v4781_v54  ;;  %2968 = vmatprep.mubr.msk.bf16.mxu1 %vm3342_vm0, %v4780_v48 }
 0x59c   : > { %2039 = vmatpush1.bf16.msra.mxu0 %v4277_v63  ;;  %2955 = vmatpush3.bf16.msra.mxu1 %v4397_v42 }
 0x59d   : > { %2040 = vmatprep.subr.bf16.mxu0 %v4284_v47  ;;  %2956 = vmatprep.subr.bf16.mxu1 %v4780_v48 }
 0x5a0   : > { %2041 = vmatpush1.bf16.msra.mxu0 %v4291_v57  ;;  %2957 = vmatpush3.bf16.msra.mxu1 %v4406_v11 }
 0x5a1   : > { %2042 = vmatprep.subr.bf16.mxu0 %v4298_v53  ;;  %2958 = vmatprep.subr.bf16.mxu1 %v4780_v48 }
 0x5a4   : > { %2043 = vmatpush1.bf16.msra.mxu0 %v4414_v16  ;;  %2959 = vmatpush3.bf16.msra.mxu1 %v4420_v0 }
 0x5a5   : > { %2044 = vmatprep.subr.bf16.mxu0 %v4426_v60  ;;  %2960 = vmatprep.subr.bf16.mxu1 %v4780_v48 }
 0x5a8   : > { %2045 = vmatpush1.bf16.msra.mxu0 %v4433_v9  ;;  %2961 = vmatpush3.bf16.msra.mxu1 %v4439_v4 }
 0x5a9   : > { %2046 = vmatprep.subr.bf16.mxu0 %v4812_v25  ;;  %2962 = vmatprep.subr.bf16.mxu1 %v4780_v48 }
 0x5ac   : > { %2047 = vmatpush1.bf16.msra.mxu0 %v4813_v52  ;;  %2963 = vmatpush3.bf16.msra.mxu1 %v4814_v58 }
 0x5ad   : > { %2048 = vmatprep.subr.bf16.mxu0 %v4815_v22  ;;  %2964 = vmatprep.subr.bf16.mxu1 %v4780_v48 }
 0x5b0   : > { %2049 = vmatpush1.bf16.msra.mxu0 %v4816_v62  ;;  %2965 = vmatpush3.bf16.msra.mxu1 %v4817_v2  ;;  %v1795_v62 = vadd.f32 %v1794_v3, %v3893_v7  ;;  %v1834_v3 = vadd.f32 %v4545_v1, %v3901_v12 }
 0x5b1   : > { %2050 = vmatprep.subr.bf16.mxu0 %v4818_v50  ;;  %2966 = vmatprep.subr.bf16.mxu1 %v4780_v48 }
 0x5b4   : > { %2051 = vmatpush1.bf16.msra.mxu0 %v4819_v31  ;;  %2967 = vmatpush3.bf16.msra.mxu1 %v4820_v43 }
 0x5b5   : > { %2150 = vmatprep.subr.bf16.mxu0 %v4821_v56  ;;  %2972 = vmatprep.subr.bf16.mxu1 %v4780_v48 }
 0x637   : > { %v1874_v26 = vpop.f32.mrf.mxu0  ;;  %v1915_v27 = vpop.f32.mrf.mxu1 }
 0x638   : > { %v1921_v28 = vadd.f32 %v1874_v26, %v1793_v10  ;;  %v4592_v10 = vld [vmem:[%s4717_s6] ss:$0 sm:$0xff] }
 0x639   : > { %v1876_v29 = vpop.f32.mrf.mxu0  ;;  %v2930_v15 = vpop.f32.mrf.mxu1 }
 0x63a   : > { %v2534_v23 = vmul.f32 -1.442695, %v1921_v28  ;;  %v1928_v43 = vadd.f32 %v1876_v29, %v1795_v62  ;;  %v1949_v28 = vpop.permute.xlu1 %1948 }
 0x63b   : > { %v1878_v2 = vpop.f32.mrf.mxu0  ;;  %v1918_v50 = vpop.f32.mrf.mxu1  ;;  %vm1950_vm14 = vcmp.eq.s32.totalorder %v1949_v28, 1 }
 0x63c   : > { %3189 = vpow2.f32 %v2534_v23  ;;  %v2535_v58 = vmul.f32 -1.442695, %v1928_v43  ;;  %v1935_v2 = vadd.f32 %v4592_v10, %v1915_v27  ;;  %v2145_v23 = vpop.permute.xlu0 %2144 }
 0x63d   : > { %v1879_v31 = vpop.f32.mrf.mxu0  ;;  %v2931_v22 = vpop.f32.mrf.mxu1  ;;  %vm2146_vm15 = vcmp.eq.s32.totalorder %v2145_v23, 1 }
 0x63e   : > { %3191 = vpow2.f32 %v2535_v58 }
 0x649   : > { %v3190_v56 = vpop.eup %3189 }
 0x64a   : > { %v1925_v52 = vadd.f32 1.0, %v3190_v56 }
 0x64b   : > { %v3192_v32 = vpop.eup %3191 }
 0x64c   : > { %3193 = vrcp.f32 %v1925_v52  ;;  %v1932_v51 = vadd.f32 1.0, %v3192_v32 }
 0x64e   : > { %3195 = vrcp.f32 %v1932_v51 }
 0x659   : > { %v3194_v50 = vpop.eup %3193 }
 0x65a   : > { %v1936_v22 = vmul.f32 %v3194_v50, %v1935_v2 }
 0x65b   : > { %v3196_v58 = vpop.eup %3195 }
 0x65c   : > { %v1937_v62 = vadd.f32 %v1936_v22, %v1834_v3  ;;  %v1939_v31 = vsub.f32 1.0, %v3196_v58  ;;  %v1941_v26 = vmul.f32 %v3196_v58, %v4510_v55 }
 0x65e   : > { %3197 = vtanh.f32 %v1937_v62 }
 0x66b   : > { %v3198_v52 = vpop.eup %3197 }
 0x66c   : > { %v1940_v43 = vmul.f32 %v3198_v52, %v1939_v31 }
 0x66e   : > { %v1942_v29 = vadd.f32 %v1941_v26, %v1940_v43 }
 0x670   : > { %v4599_v15 = vsel %vm1950_vm14, %v1942_v29, %v4510_v55 }
 0x671   : > { %v2035_v27 = vpack.c.bf16 %v4599_v15, %v4599_v15 }
 0x673   : > { %2069 = vmatmul.mubr.bf16.vlgmr.msra.gmra.mxu0 %v2035_v27  ;;  %2969 = vmatmul.mubr.bf16.vlgmr.msra.gmra.mxu1 %v2035_v27 }
 0x674   : > { %2151 = vmatpush1.bf16.msra.mxu0 %v4105_v14  ;;  %2973 = vmatpush3.bf16.msra.mxu1 %v4111_v17  ;;  %v1988_v14 = vpop.f32.mrf.mxu0  ;;  %v4634_v17 = vpop.f32.mrf.mxu1 }
 0x675   : > { %2152 = vmatprep.subr.bf16.mxu0 %v4117_v35  ;;  %2974 = vmatprep.subr.bf16.mxu1 %v4780_v48 }
 0x676   : > { %2182 = vmatprep.mubr.bf16.mxu0 %v4781_v54  ;;  %2988 = vmatprep.mubr.msk.bf16.mxu1 %vm3342_vm0, %v4780_v48  ;;  %v1990_v35 = vpop.f32.mrf.mxu0 }
 0x678   : > { %2153 = vmatpush1.bf16.msra.mxu0 %v4127_v18  ;;  %2975 = vmatpush3.bf16.msra.mxu1 %v4133_v19  ;;  %v2950_v18 = vpop.f32.mrf.mxu1  ;;  %v1992_v19 = vpop.f32.mrf.mxu0 }
 0x679   : > { %2154 = vmatprep.subr.bf16.mxu0 %v4139_v20  ;;  %2976 = vmatprep.subr.bf16.mxu1 %v4780_v48 }
 0x67a   : > { %v2032_v20 = vpop.f32.mrf.mxu1 }
 0x67c   : > { %2155 = vmatpush1.bf16.msra.mxu0 %v4146_v21  ;;  %2977 = vmatpush3.bf16.msra.mxu1 %v4152_v33  ;;  %v1993_v21 = vpop.f32.mrf.mxu0  ;;  %v2951_v33 = vpop.f32.mrf.mxu1 }
 0x67d   : > { %2156 = vmatprep.subr.bf16.mxu0 %v4158_v34  ;;  %2978 = vmatprep.subr.bf16.mxu1 %v4780_v48  ;;  %v2539_v34 = vld [vmem:[%s3474_s13 + $0x1c] sm:$0xf] }
 0x680   : > { %2157 = vmatpush1.bf16.msra.mxu0 %v4165_v36  ;;  %2979 = vmatpush3.bf16.msra.mxu1 %v4171_v37  ;;  %v4824_v36 = vld [vmem:[#allocation11_spill] sm:$0xff]  ;;  %v4825_v37 = vld [vmem:[#allocation16_spill] sm:$0xff] }
 0x681   : > { %2158 = vmatprep.subr.bf16.mxu0 %v4177_v38  ;;  %2980 = vmatprep.subr.bf16.mxu1 %v4780_v48  ;;  %v4826_v38 = vld [vmem:[#allocation12_spill] sm:$0xff] }
 0x684   : > { %2159 = vmatpush1.bf16.msra.mxu0 %v4184_v39  ;;  %2981 = vmatpush3.bf16.msra.mxu1 %v4190_v40  ;;  %v4827_v39 = vld [vmem:[#allocation13_spill] sm:$0xff] }
 0x685   : > { %2160 = vmatprep.subr.bf16.mxu0 %v4196_v45  ;;  %2982 = vmatprep.subr.bf16.mxu1 %v4780_v48  ;;  %v4828_v40 = vld [vmem:[#allocation17_spill] sm:$0xff]  ;;  %v4829_v45 = vld [vmem:[#allocation14_spill] sm:$0xff] }
 0x688   : > { %2161 = vmatpush1.bf16.msra.mxu0 %v4203_v46  ;;  %2983 = vmatpush3.bf16.msra.mxu1 %v4209_v13  ;;  %v4830_v46 = vld [vmem:[#allocation15_spill] sm:$0xff] }
 0x689   : > { %2162 = vmatprep.subr.bf16.mxu0 %v4215_v5  ;;  %2984 = vmatprep.subr.bf16.mxu1 %v4780_v48  ;;  %v4831_v13 = vld [vmem:[#allocation19_spill] sm:$0xff] }
 0x68a   : > { %v1989_v5 = vadd.f32 %v1988_v14, %v4831_v13 }
 0x68c   : > { %2163 = vmatpush1.bf16.msra.mxu0 %v4222_v44  ;;  %2985 = vmatpush3.bf16.msra.mxu1 %v4228_v61 }
 0x68d   : > { %2164 = vmatprep.subr.bf16.mxu0 %v4234_v8  ;;  %2986 = vmatprep.subr.bf16.mxu1 %v4780_v48 }
 0x690   : > { %2165 = vmatpush1.bf16.msra.mxu0 %v4245_v6  ;;  %2987 = vmatpush3.bf16.msra.mxu1 %v4375_v24 }
 0x691   : > { %2232 = vmatprep.subr.bf16.mxu0 %v4252_v49  ;;  %2992 = vmatprep.subr.bf16.mxu1 %v4780_v48 }
 0x693   : > { %2183 = vmatmul.mubr.bf16.vlgmr.msra.gmra.mxu0 %v2539_v34  ;;  %2989 = vmatmul.mubr.bf16.vlgmr.msra.gmra.mxu1 %v2539_v34 }
 0x694   : > { %2233 = vmatpush1.bf16.msra.mxu0 %v4260_v41  ;;  %2993 = vmatpush3.bf16.msra.mxu1 %v4385_v30 }
 0x695   : > { %2234 = vmatprep.subr.bf16.mxu0 %v4267_v59  ;;  %2994 = vmatprep.subr.bf16.mxu1 %v4780_v48 }
 0x696   : > { %2264 = vmatprep.mubr.bf16.mxu0 %v4781_v54  ;;  %3008 = vmatprep.mubr.msk.bf16.mxu1 %vm3342_vm0, %v4780_v48  ;;  %v4823_v54 = vld [vmem:[#allocation10_spill] sm:$0xff] }
 0x698   : > { %2235 = vmatpush1.bf16.msra.mxu0 %v4277_v63  ;;  %2995 = vmatpush3.bf16.msra.mxu1 %v4397_v42 }
 0x699   : > { %2236 = vmatprep.subr.bf16.mxu0 %v4284_v47  ;;  %2996 = vmatprep.subr.bf16.mxu1 %v4780_v48  ;;  %v1991_v47 = vadd.f32 %v1990_v35, %v3893_v7 }
 0x69c   : > { %2237 = vmatpush1.bf16.msra.mxu0 %v4291_v57  ;;  %2997 = vmatpush3.bf16.msra.mxu1 %v4406_v11 }
 0x69d   : > { %2238 = vmatprep.subr.bf16.mxu0 %v4298_v53  ;;  %2998 = vmatprep.subr.bf16.mxu1 %v4780_v48 }
 0x6a0   : > { %2239 = vmatpush1.bf16.msra.mxu0 %v4414_v16  ;;  %2999 = vmatpush3.bf16.msra.mxu1 %v4420_v0 }
 0x6a1   : > { %2240 = vmatprep.subr.bf16.mxu0 %v4426_v60  ;;  %3000 = vmatprep.subr.bf16.mxu1 %v4780_v48 }
 0x6a4   : > { %2241 = vmatpush1.bf16.msra.mxu0 %v4433_v9  ;;  %3001 = vmatpush3.bf16.msra.mxu1 %v4439_v4  ;;  %v2030_v9 = vadd.f32 %v4634_v17, %v3901_v12 }
 0x6a5   : > { %2242 = vmatprep.subr.bf16.mxu0 %v4812_v25  ;;  %3002 = vmatprep.subr.bf16.mxu1 %v4780_v48 }
 0x6a8   : > { %2243 = vmatpush1.bf16.msra.mxu0 %v4823_v54  ;;  %3003 = vmatpush3.bf16.msra.mxu1 %v4824_v36 }
 0x6a9   : > { %2244 = vmatprep.subr.bf16.mxu0 %v4825_v37  ;;  %3004 = vmatprep.subr.bf16.mxu1 %v4780_v48 }
 0x6ac   : > { %2245 = vmatpush1.bf16.msra.mxu0 %v4826_v38  ;;  %3005 = vmatpush3.bf16.msra.mxu1 %v4827_v39 }
 0x6ad   : > { %2246 = vmatprep.subr.bf16.mxu0 %v4828_v40  ;;  %3006 = vmatprep.subr.bf16.mxu1 %v4780_v48 }
 0x6b0   : > { %2247 = vmatpush1.bf16.msra.mxu0 %v4829_v45  ;;  %3007 = vmatpush3.bf16.msra.mxu1 %v4830_v46 }
 0x733   : > { %v2070_v44 = vpop.f32.mrf.mxu0  ;;  %v2111_v61 = vpop.f32.mrf.mxu1 }
 0x734   : > { %v2117_v8 = vadd.f32 %v2070_v44, %v1989_v5  ;;  %v2131_v0 = vadd.f32 %v4592_v10, %v2111_v61 }
 0x735   : > { %v2072_v6 = vpop.f32.mrf.mxu0  ;;  %v2970_v49 = vpop.f32.mrf.mxu1 }
 0x736   : > { %v2537_v41 = vmul.f32 -1.442695, %v2117_v8  ;;  %v2124_v48 = vadd.f32 %v2072_v6, %v1991_v47  ;;  %v2341_v6 = vpop.permute.xlu1 %2340 }
 0x737   : > { %v2074_v59 = vpop.f32.mrf.mxu0  ;;  %v2114_v63 = vpop.f32.mrf.mxu1  ;;  %vm2342_vm0 = vcmp.eq.s32.totalorder %v2341_v6, 1 }
 0x738   : > { %3199 = vpow2.f32 %v2537_v41  ;;  %v2538_v24 = vmul.f32 -1.442695, %v2124_v48 }
 0x739   : > { %v2075_v57 = vpop.f32.mrf.mxu0  ;;  %v2971_v53 = vpop.f32.mrf.mxu1 }
 0x73a   : > { %3201 = vpow2.f32 %v2538_v24 }
 0x745   : > { %v3200_v30 = vpop.eup %3199 }
 0x746   : > { %v2121_v42 = vadd.f32 1.0, %v3200_v30 }
 0x747   : > { %v3202_v11 = vpop.eup %3201 }
 0x748   : > { %3203 = vrcp.f32 %v2121_v42  ;;  %v2128_v16 = vadd.f32 1.0, %v3202_v11 }
 0x74a   : > { %3205 = vrcp.f32 %v2128_v16 }
 0x753   : > { %v2184_v22 = vpop.f32.mrf.mxu0  ;;  %v2225_v62 = vpop.f32.mrf.mxu1 }
 0x754   : > { %v2185_v29 = vadd.f32 %v2184_v22, %v4831_v13  ;;  %v2226_v13 = vadd.f32 %v2225_v62, %v3901_v12 }
 0x755   : > { %v3204_v60 = vpop.eup %3203  ;;  %v2186_v58 = vpop.f32.mrf.mxu0 }
 0x756   : > { %v2132_v4 = vmul.f32 %v3204_v60, %v2131_v0  ;;  %v2990_v31 = vpop.f32.mrf.mxu1  ;;  %v2187_v21 = vadd.f32 %v2186_v58, %v3893_v7 }
 0x757   : > { %v3206_v1 = vpop.eup %3205  ;;  %v2188_v52 = vpop.f32.mrf.mxu0 }
 0x758   : > { %v2133_v55 = vadd.f32 %v2132_v4, %v2030_v9  ;;  %v2135_v25 = vsub.f32 1.0, %v3206_v1  ;;  %v2137_v32 = vmul.f32 %v3206_v1, %v4599_v15  ;;  %v2228_v43 = vpop.f32.mrf.mxu1 }
 0x759   : > { %v2189_v26 = vpop.f32.mrf.mxu0 }
 0x75a   : > { %3207 = vtanh.f32 %v2133_v55  ;;  %v2991_v28 = vpop.f32.mrf.mxu1 }
 0x767   : > { %v3208_v51 = vpop.eup %3207 }
 0x768   : > { %v2136_v56 = vmul.f32 %v3208_v51, %v2135_v25 }
 0x76a   : > { %v2138_v2 = vadd.f32 %v2137_v32, %v2136_v56 }
 0x76c   : > { %v2147_v50 = vsel %vm2146_vm15, %v2138_v2, %v4599_v15 }
 0x76d   : > { %v2231_v3 = vpack.c.bf16 %v2147_v50, %v2147_v50 }
 0x76f   : > { %2265 = vmatmul.mubr.bf16.vlgmr.msra.gmra.mxu0 %v2231_v3  ;;  %3009 = vmatmul.mubr.bf16.vlgmr.msra.gmra.mxu1 %v2231_v3 }
 0x82f   : > { %v2266_v27 = vpop.f32.mrf.mxu0  ;;  %v2307_v14 = vpop.f32.mrf.mxu1 }
 0x830   : > { %v2313_v17 = vadd.f32 %v2266_v27, %v2185_v29  ;;  %v2327_v45 = vadd.f32 %v4592_v10, %v2307_v14 }
 0x831   : > { %v2268_v35 = vpop.f32.mrf.mxu0  ;;  %v3010_v18 = vpop.f32.mrf.mxu1 }
 0x832   : > { %v2540_v19 = vmul.f32 -1.442695, %v2313_v17  ;;  %v2320_v54 = vadd.f32 %v2268_v35, %v2187_v21 }
 0x833   : > { %v2270_v15 = vpop.f32.mrf.mxu0  ;;  %v2310_v20 = vpop.f32.mrf.mxu1 }
 0x834   : > { %3209 = vpow2.f32 %v2540_v19  ;;  %v2541_v36 = vmul.f32 -1.442695, %v2320_v54 }
 0x835   : > { %v2271_v33 = vpop.f32.mrf.mxu0  ;;  %v3011_v34 = vpop.f32.mrf.mxu1 }
 0x836   : > { %3211 = vpow2.f32 %v2541_v36 }
 0x841   : > { %v3210_v37 = vpop.eup %3209 }
 0x842   : > { %v2317_v38 = vadd.f32 1.0, %v3210_v37 }
 0x843   : > { %v3212_v39 = vpop.eup %3211 }
 0x844   : > { %3213 = vrcp.f32 %v2317_v38  ;;  %v2324_v40 = vadd.f32 1.0, %v3212_v39 }
 0x846   : > { %3215 = vrcp.f32 %v2324_v40 }
 0x851   : > { %v3214_v46 = vpop.eup %3213 }
 0x852   : > { %v2328_v5 = vmul.f32 %v3214_v46, %v2327_v45 }
 0x853   : > { %v3216_v7 = vpop.eup %3215 }
 0x854   : > { %v2329_v44 = vadd.f32 %v2328_v5, %v2226_v13  ;;  %v2331_v61 = vsub.f32 1.0, %v3216_v7  ;;  %v2333_v41 = vmul.f32 %v3216_v7, %v2147_v50 }
 0x856   : > { %3217 = vtanh.f32 %v2329_v44 }
 0x863   : > { %v3218_v8 = vpop.eup %3217 }
 0x864   : > { %v2332_v49 = vmul.f32 %v3218_v8, %v2331_v61 }
 0x866   : > { %v2334_v59 = vadd.f32 %v2333_v41, %v2332_v49 }
 0x868   : > { %v2343_v63 = vsel %vm2342_vm0, %v2334_v59, %v2147_v50 }
 0x869   : > { %2344 = vst [vmem:[#allocation2] sm:$0xff] %v2343_v63 }
 0x86a PF: > { %p2542_p4 = scmp.ne.s32.totalorder %s3320_s17, 1 }
 0x86c   : > { %2348 = sbr.rel (%p2542_p4) target bundleno = 2306 (0x902), region = 105 }
 0x871   : > { %v2349_v10 = vld [vmem:[#allocation2] sm:$0xff]  ;;  %v2544_v57 = vld [vmem:[#allocation5] ss:$0 sm:$0xff]  ;;  %vm2368_vm1 = vcmask 7168  }
 0x872   : > { %v2543_v12 = vld [vmem:[%s4718_s7] ss:$0 sm:$0xff] }
 0x873   : > { %v2357_v47 = vmul.f32 %v2543_v12, %v2349_v10 }
 0x875   : > { %2358 = vadd.xlane.f32.xlu0 %v2357_v47 }
 0x8fe   : > { %v2359_v53 = vpop.xlane.xlu0 %2358 }
 0x8ff   : > { %v2367_v48 = vadd.f32 %v2544_v57, %v2359_v53 }
 0x901   : > { %2369 = vst.msk [vmem:[%s3472_s12] sm:$0xff] %vm2368_vm1, %v2367_v48 }
 0x902 PF: > { %s27_s20 = sadd.s32 1, %s3336_s20   ;;  %s4832_s16 = smov %s3316_s0 }
 0x903   : > { %p24_p5 = scmp.ge.s32.totalorder %s27_s20, 6   ;;  %s4833_s0 = smov %s3450_s27 }
 0x904   : > { %s4834_s17 = smov %s3328_s18  ;;  %s4835_s8 = smov %s3332_s19 }
 0x905   : > { %s4836_s18 = smov %s4839_s21  ;;  %s4837_s19 = smov %s4843_s22 }
 0x906   :  { %26 = sbr.rel (!%p24_p5) target bundleno = 19 (0x13), region = 150 }

</bundles_post_ra>
